<compile_context>
chip_gen: v6e
topology: v6e:2x2x1
jax: 0.10.0
libtpu: 0.0.40
codegen_flags: <defaults>
</compile_context>

<pallas_src>
import math

import numpy as np
import jax
import jax.numpy as jnp
from jax import lax
from jax.experimental import pallas as pl
from jax.experimental.pallas import tpu as pltpu


def _round_up(v, m):
    return ((v + m - 1) // m) * m


# ----------------------------------------------------------------------------
# Static per-layer geometry (mirrors the PyTorch size bookkeeping exactly:
# conv3x3 pad=1 stride=1 keeps H,W; MaxPool2d(2) floors H,W by 2).
# ----------------------------------------------------------------------------
def layer_geometry(in_size, filters, pool_every):
    C, H, W = in_size
    n = len(filters)
    geoms = []
    for i, f in enumerate(filters):
        do_bn = ((i + 1) % pool_every == 0)
        do_pool = do_bn or (i == n - 1 and n % pool_every != 0)
        Ho, Wo = (H // 2, W // 2) if do_pool else (H, W)
        geoms.append(dict(Cin=C, Cout=f, H=H, W=W, Ho=Ho, Wo=Wo,
                          do_pool=do_pool, do_bn=do_bn))
        C, H, W = f, Ho, Wo
    return geoms, (C, H, W)


def _layouts(geoms, N):
    """Flat padded-slab layout constants per conv layer."""
    lay = []
    for g in geoms:
        Wp = g["W"] + 2                       # padded width
        Lp = (g["H"] + 2) * Wp                # flat padded size per image
        Mp = N * Lp                           # flat padded size, whole batch
        Mpe = Mp + Wp + 2                     # widened so pool taps stay in range
        P = _round_up(Mpe + 2 * Wp + 2, 128)  # padded-activation slab width
        lay.append(dict(Wp=Wp, Lp=Lp, Mp=Mp, Mpe=Mpe, P=P))
    return lay


def _build_selection_and_mask(geoms, lay, N):
    """Constant 0/1 matrices: pooled-position pick + scatter into the next
    layer's zero-halo padded slab (or the compact flatten for the last layer),
    plus the interior mask used to keep the halo exactly zero after BN."""
    n_conv = len(geoms)
    sel_mats, masks = [], []
    for i, g in enumerate(geoms):
        Wp, Lp, Mp = lay[i]["Wp"], lay[i]["Lp"], lay[i]["Mp"]
        Ho, Wo = g["Ho"], g["Wo"]
        stride = 2 if g["do_pool"] else 1
        last = (i == n_conv - 1)
        if last:
            ncols = N * Ho * Wo
            Wpn = Lpn = None
        else:
            ncols = lay[i + 1]["P"]
            Wpn, Lpn = lay[i + 1]["Wp"], lay[i + 1]["Lp"]
        S = np.zeros((Mp, ncols), np.float32)
        m = np.zeros((1, ncols), np.float32)
        for n in range(N):
            for h in range(Ho):
                for w in range(Wo):
                    r = n * Lp + (stride * h) * Wp + (stride * w)
                    if last:
                        q = n * (Ho * Wo) + h * Wo + w
                    else:
                        q = n * Lpn + (h + 1) * Wpn + (w + 1)
                    S[r, q] = 1.0
                    m[0, q] = 1.0
        sel_mats.append(jnp.asarray(S, jnp.bfloat16))
        masks.append(jnp.asarray(m, jnp.float32))
    return sel_mats, masks


# ----------------------------------------------------------------------------
# Fully fused forward-pass kernel builder.
# ----------------------------------------------------------------------------
def make_forward(in_size, out_classes, filters, pool_every, hidden_dims,
                 batch, eps=1e-5):
    geoms, (Cf, Hf, Wf) = layer_geometry(in_size, filters, pool_every)
    N = batch
    n_conv = len(filters)
    n_fc = len(hidden_dims) + 1
    C0 = in_size[0]
    lay = _layouts(geoms, N)
    sel_mats, masks = _build_selection_and_mask(geoms, lay, N)

    # Scratch: one bf16 padded slab per conv layer (layer 0's comes in as an
    # input) plus one bf16 im2col patch matrix per conv layer.  ~90 KiB total.
    scratch_shapes = []
    for i in range(1, n_conv):
        scratch_shapes.append(
            pltpu.VMEM((geoms[i]["Cin"], lay[i]["P"]), jnp.bfloat16))
    for i in range(n_conv):
        scratch_shapes.append(
            pltpu.VMEM((9 * geoms[i]["Cin"], lay[i]["Mpe"]), jnp.bfloat16))

    def kernel(*refs):
        it = iter(refs)
        pad0_ref = next(it)
        conv_w, conv_b, sel_refs, bn_g, bn_b, mask_refs = [], [], [], [], [], []
        for i, g in enumerate(geoms):
            conv_w.append(next(it))
            conv_b.append(next(it))
            sel_refs.append(next(it))
            if g["do_bn"]:
                bn_g.append(next(it))
                bn_b.append(next(it))
                mask_refs.append(next(it) if i < n_conv - 1 else None)
            else:
                bn_g.append(None)
                bn_b.append(None)
                mask_refs.append(None)
        fc_w, fc_b = [], []
        for _ in range(n_fc):
            fc_w.append(next(it))
            fc_b.append(next(it))
        out_ref = next(it)
        pad_refs = [pad0_ref] + [next(it) for _ in range(n_conv - 1)]
        patch_refs = [next(it) for _ in range(n_conv)]

        feat = None
        for i, g in enumerate(geoms):
            Ci, Co = g["Cin"], g["Cout"]
            Wp, Mp, Mpe = lay[i]["Wp"], lay[i]["Mp"], lay[i]["Mpe"]
            pad_ref, patch_ref = pad_refs[i], patch_refs[i]

            # --- im2col: nine contiguous lane-offset taps (lane-dense) -------
            for t in range(9):
                dy, dx = divmod(t, 3)
                off = dy * Wp + dx
                patch_ref[t * Ci:(t + 1) * Ci, :] = pad_ref[:, off:off + Mpe]

            # --- 3x3 conv as ONE MXU matmul (bf16 in, f32 accum) + bias+ReLU -
            acc = jnp.dot(conv_w[i][...], patch_ref[...],
                          preferred_element_type=jnp.float32)      # (Co, Mpe)
            acc = jnp.maximum(acc + conv_b[i][...], 0.0)

            # --- 2x2 max-pool via shifted lane slices (floor, MaxPool2d(2)) --
            # Only valid pool bases survive the selection matmul below, so the
            # garbage padded-border outputs never influence the result.
            if g["do_pool"]:
                ph = jnp.maximum(
                    jnp.maximum(acc[:, 0:Mp], acc[:, 1:Mp + 1]),
                    jnp.maximum(acc[:, Wp:Wp + Mp], acc[:, Wp + 1:Wp + 1 + Mp]))
            else:
                ph = acc[:, 0:Mp]

            # --- compaction + zero-halo re-padding (or final flatten) as one
            #     MXU matmul against a constant 0/1 selection matrix ----------
            sel = jnp.dot(ph.astype(jnp.bfloat16), sel_refs[i][...],
                          preferred_element_type=jnp.float32)

            cnt = float(N * g["Ho"] * g["Wo"])
            last = (i == n_conv - 1)
            if g["do_bn"]:
                # Training-mode BatchNorm2d, one-pass biased batch statistics.
                # The zero halo contributes 0 to both sums, so dividing by the
                # true element count gives exact stats.
                s1 = jnp.sum(sel, axis=1, keepdims=True)
                s2 = jnp.sum(sel * sel, axis=1, keepdims=True)
                mean = s1 * (1.0 / cnt)
                var = jnp.maximum(s2 * (1.0 / cnt) - mean * mean, 0.0)
                scale = bn_g[i][...] * lax.rsqrt(var + eps)
                shift = bn_b[i][...] - mean * scale
                if last:
                    nxt = sel * scale + shift
                else:
                    # keep the next conv's 1-pixel zero halo exactly zero
                    nxt = sel * scale + shift * mask_refs[i][...]
            else:
                nxt = sel
            if last:
                feat = nxt                                  # (Cf, N*Hf*Wf) f32
            else:
                pad_refs[i + 1][...] = nxt.astype(jnp.bfloat16)

        # --- classifier: (Linear -> ReLU)*M -> Linear, straight from vregs ---
        # The PyTorch (C,H,W) flatten order is folded into per-channel
        # row-blocks of the fc1 weight, so `feat` needs no rearrangement.
        HW = Hf * Wf
        for n in range(N):
            h = fc_b[0][...]                                # (1, D1) f32
            for c in range(Cf):
                h = h + jnp.dot(
                    feat[c:c + 1, n * HW:(n + 1) * HW].astype(jnp.bfloat16),
                    fc_w[0][c * HW:(c + 1) * HW, :],
                    preferred_element_type=jnp.float32)
            for j in range(1, n_fc):
                h = jnp.maximum(h, 0.0)
                h = jnp.dot(h.astype(jnp.bfloat16), fc_w[j][...],
                            preferred_element_type=jnp.float32) + fc_b[j][...]
            out_ref[n:n + 1, :] = h

    out_shape = jax.ShapeDtypeStruct((N, out_classes), jnp.float32)
    Lp0, P0 = lay[0]["Lp"], lay[0]["P"]

    def forward(x_nchw, conv_params, bn_params, fc_params):
        # Tiny XLA layout prep of the 8 KiB input (NCHW -> channel-major flat
        # zero-padded slab, bf16).  Everything else runs in one fused Pallas
        # kernel; activations never leave VMEM.
        xt = jnp.transpose(x_nchw.astype(jnp.float32), (1, 0, 2, 3))
        xp = jnp.pad(xt, ((0, 0), (0, 0), (1, 1), (1, 1)))
        flat = xp.reshape(C0, N * Lp0)
        flat = jnp.pad(flat, ((0, 0), (0, P0 - N * Lp0)))
        args = [flat.astype(jnp.bfloat16)]
        bn_i = 0
        for i, g in enumerate(geoms):
            args.extend(conv_params[i])
            args.append(sel_mats[i])
            if g["do_bn"]:
                args.extend(bn_params[bn_i])
                bn_i += 1
                if i < n_conv - 1:
                    args.append(masks[i])
        for wb in fc_params:
            args.extend(wb)
        return pl.pallas_call(
            kernel,
            out_shape=out_shape,
            scratch_shapes=scratch_shapes,
        )(*args)

    return jax.jit(forward)


# ----------------------------------------------------------------------------
# Parameters in PyTorch layouts + packing into the kernel's layouts.
# ----------------------------------------------------------------------------
def init_torch_params(key, in_size, out_classes, filters, pool_every,
                      hidden_dims):
    """Conv2d (Cout,Cin,3,3)/(Cout,), BatchNorm2d (C,), Linear (Dout,Din)/(Dout,)."""
    _, (Cf, Hf, Wf) = layer_geometry(in_size, filters, pool_every)
    params = {"conv": [], "bn": [], "fc": []}
    cin = in_size[0]
    k = key
    for i, f in enumerate(filters):
        k, k1, k2 = jax.random.split(k, 3)
        bound = 1.0 / math.sqrt(cin * 9)
        params["conv"].append(
            (jax.random.uniform(k1, (f, cin, 3, 3), jnp.float32, -bound, bound),
             jax.random.uniform(k2, (f,), jnp.float32, -bound, bound)))
        if (i + 1) % pool_every == 0:
            params["bn"].append((jnp.ones((f,), jnp.float32),
                                 jnp.zeros((f,), jnp.float32)))
        cin = f
    din = Cf * Hf * Wf
    for d in list(hidden_dims) + [out_classes]:
        k, k1, k2 = jax.random.split(k, 3)
        bound = 1.0 / math.sqrt(din)
        params["fc"].append(
            (jax.random.uniform(k1, (d, din), jnp.float32, -bound, bound),
             jax.random.uniform(k2, (d,), jnp.float32, -bound, bound)))
        din = d
    return params


def pack_params(torch_params, in_size, filters, pool_every):
    """Convert PyTorch-layout params into the layouts the fused kernel expects."""
    geoms, _ = layer_geometry(in_size, filters, pool_every)
    conv_p = []
    for i, g in enumerate(geoms):
        w, b = torch_params["conv"][i]                  # (Co, Ci, 3, 3), (Co,)
        wk = jnp.transpose(w, (0, 2, 3, 1)).reshape(g["Cout"], 9 * g["Cin"])
        conv_p.append((wk.astype(jnp.bfloat16),
                       b.reshape(-1, 1).astype(jnp.float32)))
    bn_p = [(gm.reshape(-1, 1).astype(jnp.float32),
             bt.reshape(-1, 1).astype(jnp.float32))
            for gm, bt in torch_params["bn"]]
    fc_p = []
    for w, b in torch_params["fc"]:                     # (Dout, Din), (Dout,)
        fc_p.append((jnp.transpose(w).astype(jnp.bfloat16),
                     b.reshape(1, -1).astype(jnp.float32)))
    return conv_p, bn_p, fc_p


# ----------------------------------------------------------------------------
# Pure-XLA f32 reference (mirrors the PyTorch module, NCHW) for a sanity check.
# ----------------------------------------------------------------------------
def reference_forward(x_nchw, torch_params, in_size, filters, pool_every,
                      eps=1e-5):
    geoms, _ = layer_geometry(in_size, filters, pool_every)
    x = x_nchw.astype(jnp.float32)
    bn_i = 0
    for i, g in enumerate(geoms):
        w, b = torch_params["conv"][i]
        x = lax.conv_general_dilated(
            x, w, window_strides=(1, 1), padding=((1, 1), (1, 1)),
            dimension_numbers=("NCHW", "OIHW", "NCHW"),
            precision=lax.Precision.HIGHEST)
        x = jnp.maximum(x + b.reshape(1, -1, 1, 1), 0.0)
        if g["do_pool"]:
            x = lax.reduce_window(x, -jnp.inf, lax.max,
                                  (1, 1, 2, 2), (1, 1, 2, 2), "VALID")
        if g["do_bn"]:
            gm, bt = torch_params["bn"][bn_i]
            bn_i += 1
            m = jnp.mean(x, axis=(0, 2, 3), keepdims=True)
            v = jnp.mean((x - m) ** 2, axis=(0, 2, 3), keepdims=True)
            x = (x - m) * lax.rsqrt(v + eps)
            x = x * gm.reshape(1, -1, 1, 1) + bt.reshape(1, -1, 1, 1)
    h = x.reshape(x.shape[0], -1)
    n_fc = len(torch_params["fc"])
    for j, (w, b) in enumerate(torch_params["fc"]):
        h = jnp.dot(h, w.T, precision=lax.Precision.HIGHEST) + b
        if j < n_fc - 1:
            h = jnp.maximum(h, 0.0)
    return h


if __name__ == "__main__":
    key = jax.random.PRNGKey(0)
    pkey, xkey = jax.random.split(key)

    in_size = (4, 16, 16)       # (C, H, W)
    out_classes = 10
    filters = [8, 8]
    pool_every = 1
    hidden_dims = [32]
    batch = 2

    tparams = init_torch_params(pkey, in_size, out_classes, filters,
                                pool_every, hidden_dims)
    packed = pack_params(tparams, in_size, filters, pool_every)
    fwd = make_forward(in_size, out_classes, filters, pool_every, hidden_dims,
                       batch)

    x = jax.random.normal(xkey, (batch,) + in_size, jnp.float32)  # NCHW input
    out = jax.block_until_ready(fwd(x, *packed))

    assert out.shape == (batch, out_classes), out.shape
    assert bool(jnp.all(jnp.isfinite(out)))

    # Sanity check against a plain-XLA f32 implementation of the same module
    # (kernel uses bf16 MXU operands with f32 accumulation).
    ref = jax.block_until_ready(
        reference_forward(x, tparams, in_size, filters, pool_every))
    assert jnp.allclose(out, ref, rtol=3e-2, atol=3e-2), (out, ref)

    print("KERNEL_OK")
</pallas_src>

<mosaic_0001>
module attributes {stable_mosaic.version = 11 : i64} {
  func.func @kernel(%arg0: memref<4x768xbf16, #tpu.memory_space<vmem>>, %arg1: memref<8x36xbf16, #tpu.memory_space<vmem>>, %arg2: memref<8x1xf32, #tpu.memory_space<vmem>>, %arg3: memref<648x256xbf16, #tpu.memory_space<vmem>>, %arg4: memref<8x1xf32, #tpu.memory_space<vmem>>, %arg5: memref<8x1xf32, #tpu.memory_space<vmem>>, %arg6: memref<1x256xf32, #tpu.memory_space<vmem>>, %arg7: memref<8x72xbf16, #tpu.memory_space<vmem>>, %arg8: memref<8x1xf32, #tpu.memory_space<vmem>>, %arg9: memref<200x32xbf16, #tpu.memory_space<vmem>>, %arg10: memref<8x1xf32, #tpu.memory_space<vmem>>, %arg11: memref<8x1xf32, #tpu.memory_space<vmem>>, %arg12: memref<128x32xbf16, #tpu.memory_space<vmem>>, %arg13: memref<1x32xf32, #tpu.memory_space<vmem>>, %arg14: memref<32x10xbf16, #tpu.memory_space<vmem>>, %arg15: memref<1x10xf32, #tpu.memory_space<vmem>>, %arg16: memref<2x10xf32, #tpu.memory_space<vmem>>, %arg17: memref<8x256xbf16, #tpu.memory_space<vmem>>, %arg18: memref<36x668xbf16, #tpu.memory_space<vmem>>, %arg19: memref<72x212xbf16, #tpu.memory_space<vmem>>) attributes {dimension_semantics = [], scalar_prefetch = 0 : i64, scratch_operands = 3 : i64, tpu.core_type = #tpu.core_type<tc>} {
    %c0 = arith.constant 0 : index
    %c0_0 = arith.constant 0 : index
    %0 = vector.load %arg0[%c0, %c0_0] : memref<4x768xbf16, #tpu.memory_space<vmem>>, vector<4x668xbf16>
    %c0_1 = arith.constant 0 : index
    %c0_2 = arith.constant 0 : index
    %1 = vector.load %arg18[%c0_1, %c0_2] : memref<36x668xbf16, #tpu.memory_space<vmem>>, vector<4x668xbf16>
    tpu.vector_store %arg18[%c0_1, %c0_2], %0 {strides = array<i32>} : memref<36x668xbf16, #tpu.memory_space<vmem>>, vector<4x668xbf16>,
    %c0_3 = arith.constant 0 : index
    %c1 = arith.constant 1 : index
    %2 = vector.load %arg0[%c0_3, %c1] : memref<4x768xbf16, #tpu.memory_space<vmem>>, vector<4x668xbf16>
    %c4 = arith.constant 4 : index
    %c0_4 = arith.constant 0 : index
    %3 = vector.load %arg18[%c4, %c0_4] : memref<36x668xbf16, #tpu.memory_space<vmem>>, vector<4x668xbf16>
    tpu.vector_store %arg18[%c4, %c0_4], %2 {strides = array<i32>} : memref<36x668xbf16, #tpu.memory_space<vmem>>, vector<4x668xbf16>,
    %c0_5 = arith.constant 0 : index
    %c2 = arith.constant 2 : index
    %4 = vector.load %arg0[%c0_5, %c2] : memref<4x768xbf16, #tpu.memory_space<vmem>>, vector<4x668xbf16>
    %c8 = arith.constant 8 : index
    %c0_6 = arith.constant 0 : index
    %5 = vector.load %arg18[%c8, %c0_6] : memref<36x668xbf16, #tpu.memory_space<vmem>>, vector<4x668xbf16>
    tpu.vector_store %arg18[%c8, %c0_6], %4 {strides = array<i32>} : memref<36x668xbf16, #tpu.memory_space<vmem>>, vector<4x668xbf16>,
    %c0_7 = arith.constant 0 : index
    %c18 = arith.constant 18 : index
    %6 = vector.load %arg0[%c0_7, %c18] : memref<4x768xbf16, #tpu.memory_space<vmem>>, vector<4x668xbf16>
    %c12 = arith.constant 12 : index
    %c0_8 = arith.constant 0 : index
    %7 = vector.load %arg18[%c12, %c0_8] : memref<36x668xbf16, #tpu.memory_space<vmem>>, vector<4x668xbf16>
    tpu.vector_store %arg18[%c12, %c0_8], %6 {strides = array<i32>} : memref<36x668xbf16, #tpu.memory_space<vmem>>, vector<4x668xbf16>,
    %c0_9 = arith.constant 0 : index
    %c19 = arith.constant 19 : index
    %8 = vector.load %arg0[%c0_9, %c19] : memref<4x768xbf16, #tpu.memory_space<vmem>>, vector<4x668xbf16>
    %c16 = arith.constant 16 : index
    %c0_10 = arith.constant 0 : index
    %9 = vector.load %arg18[%c16, %c0_10] : memref<36x668xbf16, #tpu.memory_space<vmem>>, vector<4x668xbf16>
    tpu.vector_store %arg18[%c16, %c0_10], %8 {strides = array<i32>} : memref<36x668xbf16, #tpu.memory_space<vmem>>, vector<4x668xbf16>,
    %c0_11 = arith.constant 0 : index
    %c20 = arith.constant 20 : index
    %10 = vector.load %arg0[%c0_11, %c20] : memref<4x768xbf16, #tpu.memory_space<vmem>>, vector<4x668xbf16>
    %c20_12 = arith.constant 20 : index
    %c0_13 = arith.constant 0 : index
    %11 = vector.load %arg18[%c20_12, %c0_13] : memref<36x668xbf16, #tpu.memory_space<vmem>>, vector<4x668xbf16>
    tpu.vector_store %arg18[%c20_12, %c0_13], %10 {strides = array<i32>} : memref<36x668xbf16, #tpu.memory_space<vmem>>, vector<4x668xbf16>,
    %c0_14 = arith.constant 0 : index
    %c36 = arith.constant 36 : index
    %12 = vector.load %arg0[%c0_14, %c36] : memref<4x768xbf16, #tpu.memory_space<vmem>>, vector<4x668xbf16>
    %c24 = arith.constant 24 : index
    %c0_15 = arith.constant 0 : index
    %13 = vector.load %arg18[%c24, %c0_15] : memref<36x668xbf16, #tpu.memory_space<vmem>>, vector<4x668xbf16>
    tpu.vector_store %arg18[%c24, %c0_15], %12 {strides = array<i32>} : memref<36x668xbf16, #tpu.memory_space<vmem>>, vector<4x668xbf16>,
    %c0_16 = arith.constant 0 : index
    %c37 = arith.constant 37 : index
    %14 = vector.load %arg0[%c0_16, %c37] : memref<4x768xbf16, #tpu.memory_space<vmem>>, vector<4x668xbf16>
    %c28 = arith.constant 28 : index
    %c0_17 = arith.constant 0 : index
    %15 = vector.load %arg18[%c28, %c0_17] : memref<36x668xbf16, #tpu.memory_space<vmem>>, vector<4x668xbf16>
    tpu.vector_store %arg18[%c28, %c0_17], %14 {strides = array<i32>} : memref<36x668xbf16, #tpu.memory_space<vmem>>, vector<4x668xbf16>,
    %c0_18 = arith.constant 0 : index
    %c38 = arith.constant 38 : index
    %16 = vector.load %arg0[%c0_18, %c38] : memref<4x768xbf16, #tpu.memory_space<vmem>>, vector<4x668xbf16>
    %c32 = arith.constant 32 : index
    %c0_19 = arith.constant 0 : index
    %17 = vector.load %arg18[%c32, %c0_19] : memref<36x668xbf16, #tpu.memory_space<vmem>>, vector<4x668xbf16>
    tpu.vector_store %arg18[%c32, %c0_19], %16 {strides = array<i32>} : memref<36x668xbf16, #tpu.memory_space<vmem>>, vector<4x668xbf16>,
    %c0_20 = arith.constant 0 : index
    %c0_21 = arith.constant 0 : index
    %18 = vector.load %arg1[%c0_20, %c0_21] : memref<8x36xbf16, #tpu.memory_space<vmem>>, vector<8x36xbf16>
    %c0_22 = arith.constant 0 : index
    %c0_23 = arith.constant 0 : index
    %19 = vector.load %arg18[%c0_22, %c0_23] : memref<36x668xbf16, #tpu.memory_space<vmem>>, vector<36x668xbf16>
    %cst = arith.constant dense<0.000000e+00> : vector<8x668xf32>
    %20 = tpu.matmul %18, %19, %cst {dimension_numbers = #tpu.dot_dimension_numbers<[1], [0], [0], [1], [0, 0, 1, 1], [], []>} : vector<8x36xbf16>, vector<36x668xbf16>, vector<8x668xf32> -> vector<8x668xf32>
    %c0_24 = arith.constant 0 : index
    %c0_25 = arith.constant 0 : index
    %21 = vector.load %arg2[%c0_24, %c0_25] : memref<8x1xf32, #tpu.memory_space<vmem>>, vector<8x1xf32>
    %22 = vector.broadcast %21 : vector<8x1xf32> to vector<8x668xf32>
    %23 = arith.addf %20, %22 : vector<8x668xf32>
    %cst_26 = arith.constant 0.000000e+00 : f32
    %24 = vector.broadcast %cst_26 : f32 to vector<8x668xf32>
    %25 = arith.maximumf %23, %24 : vector<8x668xf32>
    %26 = vector.extract_strided_slice %25 {offsets = [0, 0], sizes = [8, 648], strides = [1, 1]} : vector<8x668xf32> to vector<8x648xf32>
    %27 = vector.extract_strided_slice %25 {offsets = [0, 1], sizes = [8, 648], strides = [1, 1]} : vector<8x668xf32> to vector<8x648xf32>
    %28 = arith.maximumf %26, %27 : vector<8x648xf32>
    %29 = vector.extract_strided_slice %25 {offsets = [0, 18], sizes = [8, 648], strides = [1, 1]} : vector<8x668xf32> to vector<8x648xf32>
    %30 = vector.extract_strided_slice %25 {offsets = [0, 19], sizes = [8, 648], strides = [1, 1]} : vector<8x668xf32> to vector<8x648xf32>
    %31 = arith.maximumf %29, %30 : vector<8x648xf32>
    %32 = arith.maximumf %28, %31 : vector<8x648xf32>
    %33 = arith.truncf %32 : vector<8x648xf32> to vector<8x648xbf16>
    %c0_27 = arith.constant 0 : index
    %c0_28 = arith.constant 0 : index
    %34 = vector.load %arg3[%c0_27, %c0_28] : memref<648x256xbf16, #tpu.memory_space<vmem>>, vector<648x256xbf16>
    %cst_29 = arith.constant dense<0.000000e+00> : vector<8x256xf32>
    %35 = tpu.matmul %33, %34, %cst_29 {dimension_numbers = #tpu.dot_dimension_numbers<[1], [0], [0], [1], [0, 0, 1, 1], [], []>} : vector<8x648xbf16>, vector<648x256xbf16>, vector<8x256xf32> -> vector<8x256xf32>
    %cst_30 = arith.constant dense<0.000000e+00> : vector<8xf32>
    %36 = vector.multi_reduction <add>, %35, %cst_30 [1] : vector<8x256xf32> to vector<8xf32>
    %37 = vector.shape_cast %36 : vector<8xf32> to vector<8x1xf32>
    %38 = arith.mulf %35, %35 : vector<8x256xf32>
    %cst_31 = arith.constant dense<0.000000e+00> : vector<8xf32>
    %39 = vector.multi_reduction <add>, %38, %cst_31 [1] : vector<8x256xf32> to vector<8xf32>
    %40 = vector.shape_cast %39 : vector<8xf32> to vector<8x1xf32>
    %cst_32 = arith.constant 7.812500e-03 : f32
    %41 = vector.broadcast %cst_32 : f32 to vector<8x1xf32>
    %42 = arith.mulf %37, %41 : vector<8x1xf32>
    %cst_33 = arith.constant 7.812500e-03 : f32
    %43 = vector.broadcast %cst_33 : f32 to vector<8x1xf32>
    %44 = arith.mulf %40, %43 : vector<8x1xf32>
    %45 = arith.mulf %42, %42 : vector<8x1xf32>
    %46 = arith.subf %44, %45 : vector<8x1xf32>
    %cst_34 = arith.constant 0.000000e+00 : f32
    %47 = vector.broadcast %cst_34 : f32 to vector<8x1xf32>
    %48 = arith.maximumf %46, %47 : vector<8x1xf32>
    %c0_35 = arith.constant 0 : index
    %c0_36 = arith.constant 0 : index
    %49 = vector.load %arg4[%c0_35, %c0_36] : memref<8x1xf32, #tpu.memory_space<vmem>>, vector<8x1xf32>
    %cst_37 = arith.constant 9.99999974E-6 : f32
    %50 = vector.broadcast %cst_37 : f32 to vector<8x1xf32>
    %51 = arith.addf %48, %50 : vector<8x1xf32>
    %52 = math.rsqrt %51 : vector<8x1xf32>
    %53 = arith.mulf %49, %52 : vector<8x1xf32>
    %c0_38 = arith.constant 0 : index
    %c0_39 = arith.constant 0 : index
    %54 = vector.load %arg5[%c0_38, %c0_39] : memref<8x1xf32, #tpu.memory_space<vmem>>, vector<8x1xf32>
    %55 = arith.mulf %42, %53 : vector<8x1xf32>
    %56 = arith.subf %54, %55 : vector<8x1xf32>
    %57 = vector.broadcast %53 : vector<8x1xf32> to vector<8x256xf32>
    %58 = arith.mulf %35, %57 : vector<8x256xf32>
    %c0_40 = arith.constant 0 : index
    %c0_41 = arith.constant 0 : index
    %59 = vector.load %arg6[%c0_40, %c0_41] : memref<1x256xf32, #tpu.memory_space<vmem>>, vector<1x256xf32>
    %60 = vector.broadcast %56 : vector<8x1xf32> to vector<8x256xf32>
    %61 = vector.broadcast %59 : vector<1x256xf32> to vector<8x256xf32>
    %62 = arith.mulf %60, %61 : vector<8x256xf32>
    %63 = arith.addf %58, %62 : vector<8x256xf32>
    %64 = arith.truncf %63 : vector<8x256xf32> to vector<8x256xbf16>
    %c0_42 = arith.constant 0 : index
    %c0_43 = arith.constant 0 : index
    %65 = vector.load %arg17[%c0_42, %c0_43] : memref<8x256xbf16, #tpu.memory_space<vmem>>, vector<8x256xbf16>
    tpu.vector_store %arg17[%c0_42, %c0_43], %64 {strides = array<i32>} : memref<8x256xbf16, #tpu.memory_space<vmem>>, vector<8x256xbf16>,
    %c0_44 = arith.constant 0 : index
    %c0_45 = arith.constant 0 : index
    %66 = vector.load %arg17[%c0_44, %c0_45] : memref<8x256xbf16, #tpu.memory_space<vmem>>, vector<8x212xbf16>
    %c0_46 = arith.constant 0 : index
    %c0_47 = arith.constant 0 : index
    %67 = vector.load %arg19[%c0_46, %c0_47] : memref<72x212xbf16, #tpu.memory_space<vmem>>, vector<8x212xbf16>
    tpu.vector_store %arg19[%c0_46, %c0_47], %66 {strides = array<i32>} : memref<72x212xbf16, #tpu.memory_space<vmem>>, vector<8x212xbf16>,
    %c0_48 = arith.constant 0 : index
    %c1_49 = arith.constant 1 : index
    %68 = vector.load %arg17[%c0_48, %c1_49] : memref<8x256xbf16, #tpu.memory_space<vmem>>, vector<8x212xbf16>
    %c8_50 = arith.constant 8 : index
    %c0_51 = arith.constant 0 : index
    %69 = vector.load %arg19[%c8_50, %c0_51] : memref<72x212xbf16, #tpu.memory_space<vmem>>, vector<8x212xbf16>
    tpu.vector_store %arg19[%c8_50, %c0_51], %68 {strides = array<i32>} : memref<72x212xbf16, #tpu.memory_space<vmem>>, vector<8x212xbf16>,
    %c0_52 = arith.constant 0 : index
    %c2_53 = arith.constant 2 : index
    %70 = vector.load %arg17[%c0_52, %c2_53] : memref<8x256xbf16, #tpu.memory_space<vmem>>, vector<8x212xbf16>
    %c16_54 = arith.constant 16 : index
    %c0_55 = arith.constant 0 : index
    %71 = vector.load %arg19[%c16_54, %c0_55] : memref<72x212xbf16, #tpu.memory_space<vmem>>, vector<8x212xbf16>
    tpu.vector_store %arg19[%c16_54, %c0_55], %70 {strides = array<i32>} : memref<72x212xbf16, #tpu.memory_space<vmem>>, vector<8x212xbf16>,
    %c0_56 = arith.constant 0 : index
    %c10 = arith.constant 10 : index
    %72 = vector.load %arg17[%c0_56, %c10] : memref<8x256xbf16, #tpu.memory_space<vmem>>, vector<8x212xbf16>
    %c24_57 = arith.constant 24 : index
    %c0_58 = arith.constant 0 : index
    %73 = vector.load %arg19[%c24_57, %c0_58] : memref<72x212xbf16, #tpu.memory_space<vmem>>, vector<8x212xbf16>
    tpu.vector_store %arg19[%c24_57, %c0_58], %72 {strides = array<i32>} : memref<72x212xbf16, #tpu.memory_space<vmem>>, vector<8x212xbf16>,
    %c0_59 = arith.constant 0 : index
    %c11 = arith.constant 11 : index
    %74 = vector.load %arg17[%c0_59, %c11] : memref<8x256xbf16, #tpu.memory_space<vmem>>, vector<8x212xbf16>
    %c32_60 = arith.constant 32 : index
    %c0_61 = arith.constant 0 : index
    %75 = vector.load %arg19[%c32_60, %c0_61] : memref<72x212xbf16, #tpu.memory_space<vmem>>, vector<8x212xbf16>
    tpu.vector_store %arg19[%c32_60, %c0_61], %74 {strides = array<i32>} : memref<72x212xbf16, #tpu.memory_space<vmem>>, vector<8x212xbf16>,
    %c0_62 = arith.constant 0 : index
    %c12_63 = arith.constant 12 : index
    %76 = vector.load %arg17[%c0_62, %c12_63] : memref<8x256xbf16, #tpu.memory_space<vmem>>, vector<8x212xbf16>
    %c40 = arith.constant 40 : index
    %c0_64 = arith.constant 0 : index
    %77 = vector.load %arg19[%c40, %c0_64] : memref<72x212xbf16, #tpu.memory_space<vmem>>, vector<8x212xbf16>
    tpu.vector_store %arg19[%c40, %c0_64], %76 {strides = array<i32>} : memref<72x212xbf16, #tpu.memory_space<vmem>>, vector<8x212xbf16>,
    %c0_65 = arith.constant 0 : index
    %c20_66 = arith.constant 20 : index
    %78 = vector.load %arg17[%c0_65, %c20_66] : memref<8x256xbf16, #tpu.memory_space<vmem>>, vector<8x212xbf16>
    %c48 = arith.constant 48 : index
    %c0_67 = arith.constant 0 : index
    %79 = vector.load %arg19[%c48, %c0_67] : memref<72x212xbf16, #tpu.memory_space<vmem>>, vector<8x212xbf16>
    tpu.vector_store %arg19[%c48, %c0_67], %78 {strides = array<i32>} : memref<72x212xbf16, #tpu.memory_space<vmem>>, vector<8x212xbf16>,
    %c0_68 = arith.constant 0 : index
    %c21 = arith.constant 21 : index
    %80 = vector.load %arg17[%c0_68, %c21] : memref<8x256xbf16, #tpu.memory_space<vmem>>, vector<8x212xbf16>
    %c56 = arith.constant 56 : index
    %c0_69 = arith.constant 0 : index
    %81 = vector.load %arg19[%c56, %c0_69] : memref<72x212xbf16, #tpu.memory_space<vmem>>, vector<8x212xbf16>
    tpu.vector_store %arg19[%c56, %c0_69], %80 {strides = array<i32>} : memref<72x212xbf16, #tpu.memory_space<vmem>>, vector<8x212xbf16>,
    %c0_70 = arith.constant 0 : index
    %c22 = arith.constant 22 : index
    %82 = vector.load %arg17[%c0_70, %c22] : memref<8x256xbf16, #tpu.memory_space<vmem>>, vector<8x212xbf16>
    %c64 = arith.constant 64 : index
    %c0_71 = arith.constant 0 : index
    %83 = vector.load %arg19[%c64, %c0_71] : memref<72x212xbf16, #tpu.memory_space<vmem>>, vector<8x212xbf16>
    tpu.vector_store %arg19[%c64, %c0_71], %82 {strides = array<i32>} : memref<72x212xbf16, #tpu.memory_space<vmem>>, vector<8x212xbf16>,
    %c0_72 = arith.constant 0 : index
    %c0_73 = arith.constant 0 : index
    %84 = vector.load %arg7[%c0_72, %c0_73] : memref<8x72xbf16, #tpu.memory_space<vmem>>, vector<8x72xbf16>
    %c0_74 = arith.constant 0 : index
    %c0_75 = arith.constant 0 : index
    %85 = vector.load %arg19[%c0_74, %c0_75] : memref<72x212xbf16, #tpu.memory_space<vmem>>, vector<72x212xbf16>
    %cst_76 = arith.constant dense<0.000000e+00> : vector<8x212xf32>
    %86 = tpu.matmul %84, %85, %cst_76 {dimension_numbers = #tpu.dot_dimension_numbers<[1], [0], [0], [1], [0, 0, 1, 1], [], []>} : vector<8x72xbf16>, vector<72x212xbf16>, vector<8x212xf32> -> vector<8x212xf32>
    %c0_77 = arith.constant 0 : index
    %c0_78 = arith.constant 0 : index
    %87 = vector.load %arg8[%c0_77, %c0_78] : memref<8x1xf32, #tpu.memory_space<vmem>>, vector<8x1xf32>
    %88 = vector.broadcast %87 : vector<8x1xf32> to vector<8x212xf32>
    %89 = arith.addf %86, %88 : vector<8x212xf32>
    %cst_79 = arith.constant 0.000000e+00 : f32
    %90 = vector.broadcast %cst_79 : f32 to vector<8x212xf32>
    %91 = arith.maximumf %89, %90 : vector<8x212xf32>
    %92 = vector.extract_strided_slice %91 {offsets = [0, 0], sizes = [8, 200], strides = [1, 1]} : vector<8x212xf32> to vector<8x200xf32>
    %93 = vector.extract_strided_slice %91 {offsets = [0, 1], sizes = [8, 200], strides = [1, 1]} : vector<8x212xf32> to vector<8x200xf32>
    %94 = arith.maximumf %92, %93 : vector<8x200xf32>
    %95 = vector.extract_strided_slice %91 {offsets = [0, 10], sizes = [8, 200], strides = [1, 1]} : vector<8x212xf32> to vector<8x200xf32>
    %96 = vector.extract_strided_slice %91 {offsets = [0, 11], sizes = [8, 200], strides = [1, 1]} : vector<8x212xf32> to vector<8x200xf32>
    %97 = arith.maximumf %95, %96 : vector<8x200xf32>
    %98 = arith.maximumf %94, %97 : vector<8x200xf32>
    %99 = arith.truncf %98 : vector<8x200xf32> to vector<8x200xbf16>
    %c0_80 = arith.constant 0 : index
    %c0_81 = arith.constant 0 : index
    %100 = vector.load %arg9[%c0_80, %c0_81] : memref<200x32xbf16, #tpu.memory_space<vmem>>, vector<200x32xbf16>
    %cst_82 = arith.constant dense<0.000000e+00> : vector<8x32xf32>
    %101 = tpu.matmul %99, %100, %cst_82 {dimension_numbers = #tpu.dot_dimension_numbers<[1], [0], [0], [1], [0, 0, 1, 1], [], []>} : vector<8x200xbf16>, vector<200x32xbf16>, vector<8x32xf32> -> vector<8x32xf32>
    %cst_83 = arith.constant dense<0.000000e+00> : vector<8xf32>
    %102 = vector.multi_reduction <add>, %101, %cst_83 [1] : vector<8x32xf32> to vector<8xf32>
    %103 = vector.shape_cast %102 : vector<8xf32> to vector<8x1xf32>
    %104 = arith.mulf %101, %101 : vector<8x32xf32>
    %cst_84 = arith.constant dense<0.000000e+00> : vector<8xf32>
    %105 = vector.multi_reduction <add>, %104, %cst_84 [1] : vector<8x32xf32> to vector<8xf32>
    %106 = vector.shape_cast %105 : vector<8xf32> to vector<8x1xf32>
    %cst_85 = arith.constant 3.125000e-02 : f32
    %107 = vector.broadcast %cst_85 : f32 to vector<8x1xf32>
    %108 = arith.mulf %103, %107 : vector<8x1xf32>
    %cst_86 = arith.constant 3.125000e-02 : f32
    %109 = vector.broadcast %cst_86 : f32 to vector<8x1xf32>
    %110 = arith.mulf %106, %109 : vector<8x1xf32>
    %111 = arith.mulf %108, %108 : vector<8x1xf32>
    %112 = arith.subf %110, %111 : vector<8x1xf32>
    %cst_87 = arith.constant 0.000000e+00 : f32
    %113 = vector.broadcast %cst_87 : f32 to vector<8x1xf32>
    %114 = arith.maximumf %112, %113 : vector<8x1xf32>
    %c0_88 = arith.constant 0 : index
    %c0_89 = arith.constant 0 : index
    %115 = vector.load %arg10[%c0_88, %c0_89] : memref<8x1xf32, #tpu.memory_space<vmem>>, vector<8x1xf32>
    %cst_90 = arith.constant 9.99999974E-6 : f32
    %116 = vector.broadcast %cst_90 : f32 to vector<8x1xf32>
    %117 = arith.addf %114, %116 : vector<8x1xf32>
    %118 = math.rsqrt %117 : vector<8x1xf32>
    %119 = arith.mulf %115, %118 : vector<8x1xf32>
    %c0_91 = arith.constant 0 : index
    %c0_92 = arith.constant 0 : index
    %120 = vector.load %arg11[%c0_91, %c0_92] : memref<8x1xf32, #tpu.memory_space<vmem>>, vector<8x1xf32>
    %121 = arith.mulf %108, %119 : vector<8x1xf32>
    %122 = arith.subf %120, %121 : vector<8x1xf32>
    %123 = vector.broadcast %119 : vector<8x1xf32> to vector<8x32xf32>
    %124 = arith.mulf %101, %123 : vector<8x32xf32>
    %125 = vector.broadcast %122 : vector<8x1xf32> to vector<8x32xf32>
    %126 = arith.addf %124, %125 : vector<8x32xf32>
    %c0_93 = arith.constant 0 : index
    %c0_94 = arith.constant 0 : index
    %127 = vector.load %arg13[%c0_93, %c0_94] : memref<1x32xf32, #tpu.memory_space<vmem>>, vector<1x32xf32>
    %128 = vector.extract_strided_slice %126 {offsets = [0, 0], sizes = [1, 16], strides = [1, 1]} : vector<8x32xf32> to vector<1x16xf32>
    %129 = arith.truncf %128 : vector<1x16xf32> to vector<1x16xbf16>
    %c0_95 = arith.constant 0 : index
    %c0_96 = arith.constant 0 : index
    %130 = vector.load %arg12[%c0_95, %c0_96] : memref<128x32xbf16, #tpu.memory_space<vmem>>, vector<16x32xbf16>
    %cst_97 = arith.constant dense<0.000000e+00> : vector<1x32xf32>
    %131 = tpu.matmul %129, %130, %cst_97 {dimension_numbers = #tpu.dot_dimension_numbers<[1], [0], [0], [1], [0, 0, 1, 1], [], []>} : vector<1x16xbf16>, vector<16x32xbf16>, vector<1x32xf32> -> vector<1x32xf32>
    %132 = arith.addf %127, %131 : vector<1x32xf32>
    %133 = vector.extract_strided_slice %126 {offsets = [1, 0], sizes = [1, 16], strides = [1, 1]} : vector<8x32xf32> to vector<1x16xf32>
    %134 = arith.truncf %133 : vector<1x16xf32> to vector<1x16xbf16>
    %c16_98 = arith.constant 16 : index
    %c0_99 = arith.constant 0 : index
    %135 = vector.load %arg12[%c16_98, %c0_99] : memref<128x32xbf16, #tpu.memory_space<vmem>>, vector<16x32xbf16>
    %cst_100 = arith.constant dense<0.000000e+00> : vector<1x32xf32>
    %136 = tpu.matmul %134, %135, %cst_100 {dimension_numbers = #tpu.dot_dimension_numbers<[1], [0], [0], [1], [0, 0, 1, 1], [], []>} : vector<1x16xbf16>, vector<16x32xbf16>, vector<1x32xf32> -> vector<1x32xf32>
    %137 = arith.addf %132, %136 : vector<1x32xf32>
    %138 = vector.extract_strided_slice %126 {offsets = [2, 0], sizes = [1, 16], strides = [1, 1]} : vector<8x32xf32> to vector<1x16xf32>
    %139 = arith.truncf %138 : vector<1x16xf32> to vector<1x16xbf16>
    %c32_101 = arith.constant 32 : index
    %c0_102 = arith.constant 0 : index
    %140 = vector.load %arg12[%c32_101, %c0_102] : memref<128x32xbf16, #tpu.memory_space<vmem>>, vector<16x32xbf16>
    %cst_103 = arith.constant dense<0.000000e+00> : vector<1x32xf32>
    %141 = tpu.matmul %139, %140, %cst_103 {dimension_numbers = #tpu.dot_dimension_numbers<[1], [0], [0], [1], [0, 0, 1, 1], [], []>} : vector<1x16xbf16>, vector<16x32xbf16>, vector<1x32xf32> -> vector<1x32xf32>
    %142 = arith.addf %137, %141 : vector<1x32xf32>
    %143 = vector.extract_strided_slice %126 {offsets = [3, 0], sizes = [1, 16], strides = [1, 1]} : vector<8x32xf32> to vector<1x16xf32>
    %144 = arith.truncf %143 : vector<1x16xf32> to vector<1x16xbf16>
    %c48_104 = arith.constant 48 : index
    %c0_105 = arith.constant 0 : index
    %145 = vector.load %arg12[%c48_104, %c0_105] : memref<128x32xbf16, #tpu.memory_space<vmem>>, vector<16x32xbf16>
    %cst_106 = arith.constant dense<0.000000e+00> : vector<1x32xf32>
    %146 = tpu.matmul %144, %145, %cst_106 {dimension_numbers = #tpu.dot_dimension_numbers<[1], [0], [0], [1], [0, 0, 1, 1], [], []>} : vector<1x16xbf16>, vector<16x32xbf16>, vector<1x32xf32> -> vector<1x32xf32>
    %147 = arith.addf %142, %146 : vector<1x32xf32>
    %148 = vector.extract_strided_slice %126 {offsets = [4, 0], sizes = [1, 16], strides = [1, 1]} : vector<8x32xf32> to vector<1x16xf32>
    %149 = arith.truncf %148 : vector<1x16xf32> to vector<1x16xbf16>
    %c64_107 = arith.constant 64 : index
    %c0_108 = arith.constant 0 : index
    %150 = vector.load %arg12[%c64_107, %c0_108] : memref<128x32xbf16, #tpu.memory_space<vmem>>, vector<16x32xbf16>
    %cst_109 = arith.constant dense<0.000000e+00> : vector<1x32xf32>
    %151 = tpu.matmul %149, %150, %cst_109 {dimension_numbers = #tpu.dot_dimension_numbers<[1], [0], [0], [1], [0, 0, 1, 1], [], []>} : vector<1x16xbf16>, vector<16x32xbf16>, vector<1x32xf32> -> vector<1x32xf32>
    %152 = arith.addf %147, %151 : vector<1x32xf32>
    %153 = vector.extract_strided_slice %126 {offsets = [5, 0], sizes = [1, 16], strides = [1, 1]} : vector<8x32xf32> to vector<1x16xf32>
    %154 = arith.truncf %153 : vector<1x16xf32> to vector<1x16xbf16>
    %c80 = arith.constant 80 : index
    %c0_110 = arith.constant 0 : index
    %155 = vector.load %arg12[%c80, %c0_110] : memref<128x32xbf16, #tpu.memory_space<vmem>>, vector<16x32xbf16>
    %cst_111 = arith.constant dense<0.000000e+00> : vector<1x32xf32>
    %156 = tpu.matmul %154, %155, %cst_111 {dimension_numbers = #tpu.dot_dimension_numbers<[1], [0], [0], [1], [0, 0, 1, 1], [], []>} : vector<1x16xbf16>, vector<16x32xbf16>, vector<1x32xf32> -> vector<1x32xf32>
    %157 = arith.addf %152, %156 : vector<1x32xf32>
    %158 = vector.extract_strided_slice %126 {offsets = [6, 0], sizes = [1, 16], strides = [1, 1]} : vector<8x32xf32> to vector<1x16xf32>
    %159 = arith.truncf %158 : vector<1x16xf32> to vector<1x16xbf16>
    %c96 = arith.constant 96 : index
    %c0_112 = arith.constant 0 : index
    %160 = vector.load %arg12[%c96, %c0_112] : memref<128x32xbf16, #tpu.memory_space<vmem>>, vector<16x32xbf16>
    %cst_113 = arith.constant dense<0.000000e+00> : vector<1x32xf32>
    %161 = tpu.matmul %159, %160, %cst_113 {dimension_numbers = #tpu.dot_dimension_numbers<[1], [0], [0], [1], [0, 0, 1, 1], [], []>} : vector<1x16xbf16>, vector<16x32xbf16>, vector<1x32xf32> -> vector<1x32xf32>
    %162 = arith.addf %157, %161 : vector<1x32xf32>
    %163 = vector.extract_strided_slice %126 {offsets = [7, 0], sizes = [1, 16], strides = [1, 1]} : vector<8x32xf32> to vector<1x16xf32>
    %164 = arith.truncf %163 : vector<1x16xf32> to vector<1x16xbf16>
    %c112 = arith.constant 112 : index
    %c0_114 = arith.constant 0 : index
    %165 = vector.load %arg12[%c112, %c0_114] : memref<128x32xbf16, #tpu.memory_space<vmem>>, vector<16x32xbf16>
    %cst_115 = arith.constant dense<0.000000e+00> : vector<1x32xf32>
    %166 = tpu.matmul %164, %165, %cst_115 {dimension_numbers = #tpu.dot_dimension_numbers<[1], [0], [0], [1], [0, 0, 1, 1], [], []>} : vector<1x16xbf16>, vector<16x32xbf16>, vector<1x32xf32> -> vector<1x32xf32>
    %167 = arith.addf %162, %166 : vector<1x32xf32>
    %cst_116 = arith.constant 0.000000e+00 : f32
    %168 = vector.broadcast %cst_116 : f32 to vector<1x32xf32>
    %169 = arith.maximumf %167, %168 : vector<1x32xf32>
    %170 = arith.truncf %169 : vector<1x32xf32> to vector<1x32xbf16>
    %c0_117 = arith.constant 0 : index
    %c0_118 = arith.constant 0 : index
    %171 = vector.load %arg14[%c0_117, %c0_118] : memref<32x10xbf16, #tpu.memory_space<vmem>>, vector<32x10xbf16>
    %cst_119 = arith.constant dense<0.000000e+00> : vector<1x10xf32>
    %172 = tpu.matmul %170, %171, %cst_119 {dimension_numbers = #tpu.dot_dimension_numbers<[1], [0], [0], [1], [0, 0, 1, 1], [], []>} : vector<1x32xbf16>, vector<32x10xbf16>, vector<1x10xf32> -> vector<1x10xf32>
    %c0_120 = arith.constant 0 : index
    %c0_121 = arith.constant 0 : index
    %173 = vector.load %arg15[%c0_120, %c0_121] : memref<1x10xf32, #tpu.memory_space<vmem>>, vector<1x10xf32>
    %174 = arith.addf %172, %173 : vector<1x10xf32>
    %c0_122 = arith.constant 0 : index
    %c0_123 = arith.constant 0 : index
    %175 = vector.load %arg16[%c0_122, %c0_123] : memref<2x10xf32, #tpu.memory_space<vmem>>, vector<1x10xf32>
    tpu.vector_store %arg16[%c0_122, %c0_123], %174 {strides = array<i32>} : memref<2x10xf32, #tpu.memory_space<vmem>>, vector<1x10xf32>,
    %c0_124 = arith.constant 0 : index
    %c0_125 = arith.constant 0 : index
    %176 = vector.load %arg13[%c0_124, %c0_125] : memref<1x32xf32, #tpu.memory_space<vmem>>, vector<1x32xf32>
    %177 = vector.extract_strided_slice %126 {offsets = [0, 16], sizes = [1, 16], strides = [1, 1]} : vector<8x32xf32> to vector<1x16xf32>
    %178 = arith.truncf %177 : vector<1x16xf32> to vector<1x16xbf16>
    %c0_126 = arith.constant 0 : index
    %c0_127 = arith.constant 0 : index
    %179 = vector.load %arg12[%c0_126, %c0_127] : memref<128x32xbf16, #tpu.memory_space<vmem>>, vector<16x32xbf16>
    %cst_128 = arith.constant dense<0.000000e+00> : vector<1x32xf32>
    %180 = tpu.matmul %178, %179, %cst_128 {dimension_numbers = #tpu.dot_dimension_numbers<[1], [0], [0], [1], [0, 0, 1, 1], [], []>} : vector<1x16xbf16>, vector<16x32xbf16>, vector<1x32xf32> -> vector<1x32xf32>
    %181 = arith.addf %176, %180 : vector<1x32xf32>
    %182 = vector.extract_strided_slice %126 {offsets = [1, 16], sizes = [1, 16], strides = [1, 1]} : vector<8x32xf32> to vector<1x16xf32>
    %183 = arith.truncf %182 : vector<1x16xf32> to vector<1x16xbf16>
    %c16_129 = arith.constant 16 : index
    %c0_130 = arith.constant 0 : index
    %184 = vector.load %arg12[%c16_129, %c0_130] : memref<128x32xbf16, #tpu.memory_space<vmem>>, vector<16x32xbf16>
    %cst_131 = arith.constant dense<0.000000e+00> : vector<1x32xf32>
    %185 = tpu.matmul %183, %184, %cst_131 {dimension_numbers = #tpu.dot_dimension_numbers<[1], [0], [0], [1], [0, 0, 1, 1], [], []>} : vector<1x16xbf16>, vector<16x32xbf16>, vector<1x32xf32> -> vector<1x32xf32>
    %186 = arith.addf %181, %185 : vector<1x32xf32>
    %187 = vector.extract_strided_slice %126 {offsets = [2, 16], sizes = [1, 16], strides = [1, 1]} : vector<8x32xf32> to vector<1x16xf32>
    %188 = arith.truncf %187 : vector<1x16xf32> to vector<1x16xbf16>
    %c32_132 = arith.constant 32 : index
    %c0_133 = arith.constant 0 : index
    %189 = vector.load %arg12[%c32_132, %c0_133] : memref<128x32xbf16, #tpu.memory_space<vmem>>, vector<16x32xbf16>
    %cst_134 = arith.constant dense<0.000000e+00> : vector<1x32xf32>
    %190 = tpu.matmul %188, %189, %cst_134 {dimension_numbers = #tpu.dot_dimension_numbers<[1], [0], [0], [1], [0, 0, 1, 1], [], []>} : vector<1x16xbf16>, vector<16x32xbf16>, vector<1x32xf32> -> vector<1x32xf32>
    %191 = arith.addf %186, %190 : vector<1x32xf32>
    %192 = vector.extract_strided_slice %126 {offsets = [3, 16], sizes = [1, 16], strides = [1, 1]} : vector<8x32xf32> to vector<1x16xf32>
    %193 = arith.truncf %192 : vector<1x16xf32> to vector<1x16xbf16>
    %c48_135 = arith.constant 48 : index
    %c0_136 = arith.constant 0 : index
    %194 = vector.load %arg12[%c48_135, %c0_136] : memref<128x32xbf16, #tpu.memory_space<vmem>>, vector<16x32xbf16>
    %cst_137 = arith.constant dense<0.000000e+00> : vector<1x32xf32>
    %195 = tpu.matmul %193, %194, %cst_137 {dimension_numbers = #tpu.dot_dimension_numbers<[1], [0], [0], [1], [0, 0, 1, 1], [], []>} : vector<1x16xbf16>, vector<16x32xbf16>, vector<1x32xf32> -> vector<1x32xf32>
    %196 = arith.addf %191, %195 : vector<1x32xf32>
    %197 = vector.extract_strided_slice %126 {offsets = [4, 16], sizes = [1, 16], strides = [1, 1]} : vector<8x32xf32> to vector<1x16xf32>
    %198 = arith.truncf %197 : vector<1x16xf32> to vector<1x16xbf16>
    %c64_138 = arith.constant 64 : index
    %c0_139 = arith.constant 0 : index
    %199 = vector.load %arg12[%c64_138, %c0_139] : memref<128x32xbf16, #tpu.memory_space<vmem>>, vector<16x32xbf16>
    %cst_140 = arith.constant dense<0.000000e+00> : vector<1x32xf32>
    %200 = tpu.matmul %198, %199, %cst_140 {dimension_numbers = #tpu.dot_dimension_numbers<[1], [0], [0], [1], [0, 0, 1, 1], [], []>} : vector<1x16xbf16>, vector<16x32xbf16>, vector<1x32xf32> -> vector<1x32xf32>
    %201 = arith.addf %196, %200 : vector<1x32xf32>
    %202 = vector.extract_strided_slice %126 {offsets = [5, 16], sizes = [1, 16], strides = [1, 1]} : vector<8x32xf32> to vector<1x16xf32>
    %203 = arith.truncf %202 : vector<1x16xf32> to vector<1x16xbf16>
    %c80_141 = arith.constant 80 : index
    %c0_142 = arith.constant 0 : index
    %204 = vector.load %arg12[%c80_141, %c0_142] : memref<128x32xbf16, #tpu.memory_space<vmem>>, vector<16x32xbf16>
    %cst_143 = arith.constant dense<0.000000e+00> : vector<1x32xf32>
    %205 = tpu.matmul %203, %204, %cst_143 {dimension_numbers = #tpu.dot_dimension_numbers<[1], [0], [0], [1], [0, 0, 1, 1], [], []>} : vector<1x16xbf16>, vector<16x32xbf16>, vector<1x32xf32> -> vector<1x32xf32>
    %206 = arith.addf %201, %205 : vector<1x32xf32>
    %207 = vector.extract_strided_slice %126 {offsets = [6, 16], sizes = [1, 16], strides = [1, 1]} : vector<8x32xf32> to vector<1x16xf32>
    %208 = arith.truncf %207 : vector<1x16xf32> to vector<1x16xbf16>
    %c96_144 = arith.constant 96 : index
    %c0_145 = arith.constant 0 : index
    %209 = vector.load %arg12[%c96_144, %c0_145] : memref<128x32xbf16, #tpu.memory_space<vmem>>, vector<16x32xbf16>
    %cst_146 = arith.constant dense<0.000000e+00> : vector<1x32xf32>
    %210 = tpu.matmul %208, %209, %cst_146 {dimension_numbers = #tpu.dot_dimension_numbers<[1], [0], [0], [1], [0, 0, 1, 1], [], []>} : vector<1x16xbf16>, vector<16x32xbf16>, vector<1x32xf32> -> vector<1x32xf32>
    %211 = arith.addf %206, %210 : vector<1x32xf32>
    %212 = vector.extract_strided_slice %126 {offsets = [7, 16], sizes = [1, 16], strides = [1, 1]} : vector<8x32xf32> to vector<1x16xf32>
    %213 = arith.truncf %212 : vector<1x16xf32> to vector<1x16xbf16>
    %c112_147 = arith.constant 112 : index
    %c0_148 = arith.constant 0 : index
    %214 = vector.load %arg12[%c112_147, %c0_148] : memref<128x32xbf16, #tpu.memory_space<vmem>>, vector<16x32xbf16>
    %cst_149 = arith.constant dense<0.000000e+00> : vector<1x32xf32>
    %215 = tpu.matmul %213, %214, %cst_149 {dimension_numbers = #tpu.dot_dimension_numbers<[1], [0], [0], [1], [0, 0, 1, 1], [], []>} : vector<1x16xbf16>, vector<16x32xbf16>, vector<1x32xf32> -> vector<1x32xf32>
    %216 = arith.addf %211, %215 : vector<1x32xf32>
    %cst_150 = arith.constant 0.000000e+00 : f32
    %217 = vector.broadcast %cst_150 : f32 to vector<1x32xf32>
    %218 = arith.maximumf %216, %217 : vector<1x32xf32>
    %219 = arith.truncf %218 : vector<1x32xf32> to vector<1x32xbf16>
    %c0_151 = arith.constant 0 : index
    %c0_152 = arith.constant 0 : index
    %220 = vector.load %arg14[%c0_151, %c0_152] : memref<32x10xbf16, #tpu.memory_space<vmem>>, vector<32x10xbf16>
    %cst_153 = arith.constant dense<0.000000e+00> : vector<1x10xf32>
    %221 = tpu.matmul %219, %220, %cst_153 {dimension_numbers = #tpu.dot_dimension_numbers<[1], [0], [0], [1], [0, 0, 1, 1], [], []>} : vector<1x32xbf16>, vector<32x10xbf16>, vector<1x10xf32> -> vector<1x10xf32>
    %c0_154 = arith.constant 0 : index
    %c0_155 = arith.constant 0 : index
    %222 = vector.load %arg15[%c0_154, %c0_155] : memref<1x10xf32, #tpu.memory_space<vmem>>, vector<1x10xf32>
    %223 = arith.addf %221, %222 : vector<1x10xf32>
    %c1_156 = arith.constant 1 : index
    %c0_157 = arith.constant 0 : index
    %224 = vector.load %arg16[%c1_156, %c0_157] : memref<2x10xf32, #tpu.memory_space<vmem>>, vector<1x10xf32>
    tpu.vector_store %arg16[%c1_156, %c0_157], %223 {strides = array<i32>} : memref<2x10xf32, #tpu.memory_space<vmem>>, vector<1x10xf32>,
    return
  }
}

</mosaic_0001>

<bundles_post_ra>
// kernel: forward.1
= control target key start
LH: loop header
LB: loop body
LE: loop exit
PB: predicated region body
PF: predicated region fallthrough
CT: control target
= control target key end

     0   :  { %s4277_s0 = inlined_call_operand.vmem [shape: bf16[4,768], index: 0, kind: input, shape index: {}]   ;;  %s4278_s1 = inlined_call_operand.vmem [shape: bf16[8,36], index: 1, kind: input, shape index: {}]   ;;  %s4279_s2 = inlined_call_operand.vmem [shape: f32[8,1], index: 2, kind: input, shape index: {}]   ;;  %s4280_s3 = inlined_call_operand.vmem [shape: bf16[648,256], index: 3, kind: input, shape index: {}]   ;;  %s4281_s4 = inlined_call_operand.vmem [shape: f32[8,1], index: 4, kind: input, shape index: {}]   ;;  %s4282_s5 = inlined_call_operand.vmem [shape: f32[8,1], index: 5, kind: input, shape index: {}]   ;;  %s4283_s6 = inlined_call_operand.vmem [shape: f32[1,256], index: 6, kind: input, shape index: {}]   ;;  %s4284_s7 = inlined_call_operand.vmem [shape: bf16[8,72], index: 7, kind: input, shape index: {}]   ;;  %s4285_s8 = inlined_call_operand.vmem [shape: f32[8,1], index: 8, kind: input, shape index: {}]   ;;  %s4286_s9 = inlined_call_operand.vmem [shape: bf16[200,32], index: 9, kind: input, shape index: {}]   ;;  %s4287_s10 = inlined_call_operand.vmem [shape: f32[8,1], index: 10, kind: input, shape index: {}]   ;;  %s4288_s11 = inlined_call_operand.vmem [shape: f32[8,1], index: 11, kind: input, shape index: {}]   ;;  %s4289_s12 = inlined_call_operand.vmem [shape: bf16[128,32], index: 12, kind: input, shape index: {}]   ;;  %s4290_s13 = inlined_call_operand.vmem [shape: f32[1,32], index: 13, kind: input, shape index: {}]   ;;  %s4291_s14 = inlined_call_operand.vmem [shape: bf16[32,10], index: 14, kind: input, shape index: {}]   ;;  %s4292_s15 = inlined_call_operand.vmem [shape: f32[1,10], index: 15, kind: input, shape index: {}]   ;;  %s4293_s16 = inlined_call_operand.hbm [shape: f32[2,10], index: 16, kind: output, shape index: {}]  }
   0x1   :  { %4295 = sst [smem:[#allocation8_spill]] %s4277_s0 }
   0x2   :  { %s4296_s23 = sld [smem:[#allocation8_spill]]  ;;  %v98_v1 = vlaneseq  ;;  %s3479_s24 = smov 90   ;;  %v3480_v3 = vmov 1983009808   ;;  %vm86_vm0 = vcmask 1041408   ;;  %vm87_vm1 = vcmask 226308  }
   0x3   :  { %v96_v4 = vunpack.c.l.s4 %v3480_v3  ;;  %s3481_s27 = smov 109   ;;  %vm3593_vm2 = vmor %vm87_vm1, %vm86_vm0  ;;  %s3482_s28 = smov 108   ;;  %v3488_v22 = vmov 0  }
   0x4   :  { %v3589_v5 = vshrl.u32 %v98_v1, 7  ;;  %s3483_s0 = smov 92   ;;  %s3484_s19 = smov 91   ;;  %625 = vmatprep.mubr.bf16.mxu0 %v3488_v22  ;;  %666 = vmatprep.mubr.bf16.mxu1 %v3488_v22 }
   0x5   :  { %v97_v7 = vunpack.c.0.s8 %v96_v4  ;;  %s3485_s22 = smov 127   ;;  %s3486_s26 = smov 126   ;;  %3219 = vset.pattern.permute.xlu0 %v3488_v22  ;;  %3245 = vset.pattern.permute.xlu1 %v3488_v22 }
   0x7   :  { %v100_v8 = vsub.s32 %v97_v7, %v3589_v5 }
   0x8   :  { %v2875_v0 = vld.sshfl [vmem:[%s4296_s23 + $0x8] sm:$0x33 pattern:$0x76325410]  ;;  %v427_v2 = vld [vmem:[%s4296_s23] sm:$0xff] }
   0x9   :  { %457 = vrot.lane.b32.xlu1 %v2875_v0, %s3479_s24  ;;  %v431_v6 = vcombine.high %v427_v2, %v427_v2  ;;  %2870 = vst.sshfl [vmem:[#allocation3] sm:$0xf pattern:$0x76325410] %v427_v2  ;;  %89 = vst.msk [vmem:[#allocation3 + $0x10] sm:$0x33] %vm3593_vm2, %v2875_v0  ;;  %v438_v10 = vrot.slane %v427_v2, %v100_v8  ;;  %v288_v12 = vcombine.low %v427_v2, %v427_v2 }
   0xa   :  { %v3258_v13 = vld [vmem:[%s4296_s23 + $0x8] ss:$0 sps:$4 sm:$0xff]  }
   0xb   :  { %2871 = vst.sshfl [vmem:[#allocation3 + $0x8] sm:$0xf pattern:$0x76325410] %v431_v6  ;;  %453 = vrot.lane.b32.xlu0 %v438_v10, %s3479_s24  ;;  %v445_v11 = vrot.slane %v431_v6, %v100_v8  ;;  %v295_v14 = vrot.slane %v288_v12, %v100_v8  ;;  %v310_v15 = vrot.slane %v3258_v13, %v100_v8  ;;  %v3260_v16 = vld [vmem:[%s4296_s23 + $0x8] ss:$0 sps:$4 sm:$0xff]  }
   0xc   :  { %v3259_v17 = vld [vmem:[%s4296_s23 + $0x8] ss:$0 sps:$4 sm:$0xff]   ;;  %v116_v18 = vrot.slane %v3260_v16, %v100_v8 }
   0xd   :  { %267 = vrot.lane.b32.xlu1 %v2875_v0, %s3481_s27  ;;  %v405_v19 = vrot.slane %v3259_v17, %v100_v8  ;;  %v3261_v20 = vld [vmem:[%s4296_s23 + $0x8] ss:$0 sps:$4 sm:$0xff]  }
   0xe   :  { %v215_v21 = vrot.slane %v3261_v20, %v100_v8 }
   0xf   :  { %455 = vrot.lane.b32.xlu0 %v445_v11, %s3479_s24 }
  0x11   :  { %263 = vrot.lane.b32.xlu1 %v438_v10, %s3481_s27 }
  0x13   :  { %265 = vrot.lane.b32.xlu0 %v445_v11, %s3481_s27  ;;  %s3487_s27 = smov 110  }
  0x15   :  { %313 = vrot.lane.b32.xlu1 %v438_v10, %s3482_s28 }
  0x17   :  { %311 = vrot.lane.b32.xlu0 %v295_v14, %s3482_s28 }
  0x19   :  { %358 = vrot.lane.b32.xlu1 %v438_v10, %s3483_s0 }
  0x1b   :  { %315 = vrot.lane.b32.xlu0 %v310_v15, %s3482_s28 }
  0x1d   :  { %362 = vrot.lane.b32.xlu1 %v2875_v0, %s3483_s0 }
  0x1f   :  { %360 = vrot.lane.b32.xlu0 %v445_v11, %s3483_s0 }
  0x21   :  { %408 = vrot.lane.b32.xlu1 %v438_v10, %s3484_s19 }
  0x23   :  { %406 = vrot.lane.b32.xlu0 %v295_v14, %s3484_s19 }
  0x25   :  { %117 = vrot.lane.b32.xlu1 %v295_v14, %s3485_s22 }
  0x27   :  { %410 = vrot.lane.b32.xlu0 %v405_v19, %s3484_s19 }
  0x29   :  { %121 = vrot.lane.b32.xlu1 %v116_v18, %s3485_s22 }
  0x2b   :  { %119 = vrot.lane.b32.xlu0 %v438_v10, %s3485_s22 }
  0x2d   :  { %170 = vrot.lane.b32.xlu1 %v445_v11, %s3486_s26 }
  0x2f   :  { %168 = vrot.lane.b32.xlu0 %v438_v10, %s3486_s26 }
  0x31   :  { %216 = vrot.lane.b32.xlu1 %v295_v14, %s3487_s27 }
  0x33   :  { %172 = vrot.lane.b32.xlu0 %v2875_v0, %s3486_s26 }
  0x35   :  { %220 = vrot.lane.b32.xlu1 %v215_v21, %s3487_s27 }
  0x37   :  { %218 = vrot.lane.b32.xlu0 %v438_v10, %s3487_s27 }
  0x38   :  { %21 = vsyncpa [#allocation6], 0  ;;  %v490_v23 = vld [vmem:[%s4279_s2] sm:$0xff]  ;;  %vm463_vm3 = vcmask 736256   ;;  %vm273_vm4 = vcmask 891904   ;;  %vm126_vm5 = vcmask 1043456  }
  0x39   :  { %vm368_vm6 = vcmask 752640   ;;  %vm321_vm7 = vcmask 883712   ;;  %vm138_vm8 = vcmask 1043458   ;;  %vm139_vm9 = vcmask 228358   ;;  %s3492_s25 = smov 116   ;;  %s3493_s23 = smov 118  }
  0x3a   :  { %vm3649_vm10 = vmor %vm139_vm9, %vm138_vm8  ;;  %vm128_vm11 = vcmask 1039360   ;;  %vm416_vm12 = vcmask 744448   ;;  %vm226_vm13 = vcmask 900096   ;;  %vm178_vm14 = vcmask 1031168  }
  0x3b   :  { %493 = vperm.xlu0 %3219, %v490_v23   ;;  %vm571_vm15 = vcmask 293888   ;;  %vm1478_vm1 = vcmask 687108   ;;  %vm1502_vm8 = vcmask 965632   ;;  %vm1611_vm9 = vcmask 588800  }
  0x7b   :  { %v458_v24 = vpop.permute.xlu1 %457 }
  0x7c   :  { %v461_v25 = vrot.slane %v458_v24, 4 }
  0x7d   :  { %v454_v30 = vpop.permute.xlu0 %453 }
  0x7e   :  { %v467_v26 = vsel %vm463_vm3, %v458_v24, %v461_v25  ;;  %v459_v34 = vrot.slane %v454_v30, 4 }
  0x7f   :  { %473 = vst.msk [vmem:[#allocation3 + $0x70] sm:$0x33] %vm3593_vm2, %v467_v26  ;;  %v268_v27 = vpop.permute.xlu1 %267 }
  0x80   :  { %v271_v28 = vrot.slane %v268_v27, 4 }
  0x81   :  { %v456_v32 = vpop.permute.xlu0 %455 }
  0x82   :  { %v277_v29 = vsel %vm273_vm4, %v268_v27, %v271_v28  ;;  %v460_v35 = vrot.slane %v456_v32, 4 }
  0x83   :  { %283 = vst.msk [vmem:[#allocation3 + $0x40] sm:$0x33] %vm3593_vm2, %v277_v29  ;;  %v264_v31 = vpop.permute.xlu1 %263 }
  0x84   :  { %v462_v36 = vsel %vm126_vm5, %v459_v34, %v460_v35  ;;  %v465_v37 = vsel %vm126_vm5, %v460_v35, %v461_v25  ;;  %v269_v38 = vrot.slane %v264_v31, 4 }
  0x85   :  { %v464_v39 = vsel %vm463_vm3, %v454_v30, %v462_v36  ;;  %v466_v40 = vsel %vm463_vm3, %v456_v32, %v465_v37  ;;  %v266_v41 = vpop.permute.xlu0 %265  ;;  %vm1546_vm3 = vcmask 867328  }
  0x86   :  { %471 = vst [vmem:[#allocation3 + $0x60] sm:$0x33] %v464_v39  ;;  %472 = vst [vmem:[#allocation3 + $0x68] sm:$0x33] %v466_v40  ;;  %v270_v43 = vrot.slane %v266_v41, 4 }
  0x87   :  { %v314_v33 = vpop.permute.xlu1 %313 }
  0x88   :  { %v272_v44 = vsel %vm126_vm5, %v269_v38, %v270_v43  ;;  %v275_v45 = vsel %vm126_vm5, %v270_v43, %v271_v28  ;;  %v318_v46 = vrot.slane %v314_v33, 4 }
  0x89   :  { %v274_v47 = vsel %vm273_vm4, %v264_v31, %v272_v44  ;;  %v276_v48 = vsel %vm273_vm4, %v266_v41, %v275_v45  ;;  %v312_v49 = vpop.permute.xlu0 %311  ;;  %vm1511_vm4 = vcmask 957440  }
  0x8a   :  { %281 = vst [vmem:[#allocation3 + $0x30] sm:$0x33] %v274_v47  ;;  %282 = vst [vmem:[#allocation3 + $0x38] sm:$0x33] %v276_v48  ;;  %v317_v51 = vrot.slane %v312_v49, 4 }
  0x8b   :  { %v359_v42 = vpop.permute.xlu1 %358 }
  0x8c   :  { %v320_v53 = vsel %vm126_vm5, %v317_v51, %v318_v46  ;;  %v364_v11 = vrot.slane %v359_v42, 4 }
  0x8d   :  { %v322_v55 = vsel %vm321_vm7, %v312_v49, %v320_v53  ;;  %v316_v56 = vpop.permute.xlu0 %315  ;;  %v487_v57 = vld [vmem:[#allocation3 + $0x60] sm:$0x33]  ;;  %v488_v58 = vld [vmem:[#allocation3 + $0x68] sm:$0x33] }
  0x8e   :  { %329 = vst [vmem:[#allocation3 + $0x30] sm:$0xcc] %v322_v55  ;;  %v319_v61 = vrot.slane %v316_v56, 4  ;;  %v2889_v62 = vcombine.high %v487_v57, %v487_v57  ;;  %v2891_v63 = vcombine.high %v488_v58, %v488_v58  ;;  %v2888_v0 = vcombine.low %v487_v57, %v487_v57 }
  0x8f   :  { %v363_v50 = vpop.permute.xlu1 %362  ;;  %v2890_v1 = vcombine.low %v488_v58, %v488_v58 }
  0x90   :  { %v366_v52 = vrot.slane %v363_v50, 4  ;;  %v323_v2 = vsel %vm126_vm5, %v318_v46, %v319_v61  ;;  %v325_v3 = vsel %vm321_vm7, %v316_v56, %v319_v61  ;;  %2894 = vmatprep.subr.msk.bf16.mxu0 %vm86_vm0, %v2889_v62  ;;  %2896 = vmatprep.subr.msk.bf16.mxu1 %vm86_vm0, %v2891_v63  ;;  %v576_v7 = vsel %vm86_vm0, %v2888_v0, 0 }
  0x91   :  { %v324_v4 = vsel %vm321_vm7, %v314_v33, %v323_v2  ;;  %331 = vst.msk [vmem:[#allocation3 + $0x40] sm:$0xcc] %vm3649_vm10, %v325_v3  ;;  %v361_v6 = vpop.permute.xlu0 %360  ;;  %v582_v8 = vsel %vm86_vm0, %v2890_v1, 0  ;;  %604 = vmatpush1.bf16.msra.mxu0 %v576_v7  ;;  %v489_v3 = vld [vmem:[#allocation3 + $0x70] sm:$0x33] }
  0x92   :  { %v372_v54 = vsel %vm368_vm6, %v363_v50, %v366_v52  ;;  %330 = vst [vmem:[#allocation3 + $0x38] sm:$0xcc] %v324_v4  ;;  %v365_v12 = vrot.slane %v361_v6, 4  ;;  %645 = vmatpush1.bf16.msra.mxu1 %v582_v8 }
  0x93   :  { %378 = vst.msk [vmem:[#allocation3 + $0x58] sm:$0x33] %vm3593_vm2, %v372_v54  ;;  %v409_v59 = vpop.permute.xlu1 %408 }
  0x94   :  { %v367_v13 = vsel %vm126_vm5, %v364_v11, %v365_v12  ;;  %v370_v14 = vsel %vm126_vm5, %v365_v12, %v366_v52  ;;  %v413_v15 = vrot.slane %v409_v59, 4  ;;  %v2892_v11 = vcombine.low %v489_v3, %v489_v3  ;;  %v474_v12 = vld [vmem:[%s4278_s1] sm:$0xf]  ;;  %s3497_s1 = smov [#allocation5]  }
  0x95   :  { %v369_v16 = vsel %vm368_vm6, %v359_v42, %v367_v13  ;;  %v371_v17 = vsel %vm368_vm6, %v361_v6, %v370_v14  ;;  %v407_v18 = vpop.permute.xlu0 %406  ;;  %v481_v42 = vld [vmem:[#allocation3 + $0x30] sm:$0xff]  ;;  %vm1537_vm6 = vcmask 875520  }
  0x96   :  { %376 = vst [vmem:[#allocation3 + $0x48] sm:$0x33] %v369_v16  ;;  %377 = vst [vmem:[#allocation3 + $0x50] sm:$0x33] %v371_v17  ;;  %v412_v20 = vrot.slane %v407_v18, 4  ;;  %v588_v13 = vsel %vm86_vm0, %v2892_v11, 0 }
  0x97   :  { %v118_v10 = vpop.permute.xlu1 %117  ;;  %v3322_v11 = vld [vmem:[%s4280_s3 + $0x4] ss:$8 sps:$4 sm:$0xff]  }
  0x98   :  { %v415_v23 = vsel %vm126_vm5, %v412_v20, %v413_v15  ;;  %v123_v34 = vrot.slane %v118_v10, 4 }
  0x99   :  { %v417_v25 = vsel %vm416_vm12, %v407_v18, %v415_v23  ;;  %v411_v26 = vpop.permute.xlu0 %410 }
  0x9a   :  { %424 = vst [vmem:[#allocation3 + $0x48] sm:$0xcc] %v417_v25  ;;  %v414_v28 = vrot.slane %v411_v26, 4 }
  0x9b   :  { %v122_v19 = vpop.permute.xlu1 %121 }
  0x9c   :  { %v125_v21 = vrot.slane %v122_v19, 4  ;;  %v418_v29 = vsel %vm126_vm5, %v413_v15, %v414_v28  ;;  %v420_v30 = vsel %vm416_vm12, %v411_v26, %v414_v28 }
  0x9d   :  { %v419_v31 = vsel %vm416_vm12, %v409_v59, %v418_v29  ;;  %426 = vst.msk [vmem:[#allocation3 + $0x58] sm:$0xcc] %vm3649_vm10, %v420_v30  ;;  %v120_v32 = vpop.permute.xlu0 %119  ;;  %vm2357_vm12 = vcmask 73728  }
  0x9e   :  { %v132_v24 = vsel %vm128_vm11, %v122_v19, %v125_v21  ;;  %425 = vst [vmem:[#allocation3 + $0x50] sm:$0xcc] %v419_v31  ;;  %v124_v35 = vrot.slane %v120_v32, 4 }
  0x9f   :  { %141 = vst.msk [vmem:[#allocation3 + $0x10] sm:$0xcc] %vm3649_vm10, %v132_v24  ;;  %v171_v27 = vpop.permute.xlu1 %170 }
  0xa0   :  { %v127_v36 = vsel %vm126_vm5, %v123_v34, %v124_v35  ;;  %v130_v37 = vsel %vm126_vm5, %v124_v35, %v125_v21  ;;  %v175_v38 = vrot.slane %v171_v27, 4 }
  0xa1   :  { %v129_v39 = vsel %vm128_vm11, %v118_v10, %v127_v36  ;;  %v131_v40 = vsel %vm128_vm11, %v120_v32, %v130_v37  ;;  %v169_v41 = vpop.permute.xlu0 %168  ;;  %v484_v43 = vld [vmem:[#allocation3 + $0x48] sm:$0xff]  ;;  %v2893_v10 = vcombine.high %v489_v3, %v489_v3  ;;  %v3317_v3 = vld [vmem:[%s4280_s3 + $0x130] ss:$8 sps:$4 sm:$0xff]  }
  0xa2   :  { %v3266_v44 = vld [vmem:[#allocation3 + $0x34] ss:$24 sps:$4 sm:$0xff]   ;;  %136 = vst [vmem:[#allocation3] sm:$0xcc] %v129_v39  ;;  %137 = vst [vmem:[#allocation3 + $0x8] sm:$0xcc] %v131_v40  ;;  %v2882_v48 = vcombine.low %v481_v42, %v484_v43 }
  0xa3   :  { %v217_v33 = vpop.permute.xlu1 %216  ;;  %v174_v46 = vrot.slane %v169_v41, 4  ;;  %605 = vmatprep.subr.bf16.mxu0 %v3266_v44  ;;  %v3284_v42 = vld [vmem:[%s4280_s3 + $0x70] ss:$8 sps:$4 sm:$0xff]   ;;  %v3286_v43 = vld [vmem:[%s4280_s3 + $0x74] ss:$8 sps:$4 sm:$0xff]  }
  0xa4   :  { %606 = vmatpush1.bf16.msra.mxu0 %v2882_v48  ;;  %v222_v61 = vrot.slane %v217_v33, 4  ;;  %v3280_v14 = vld [vmem:[#allocation3 + $0x44] ss:$24 sps:$4 sm:$0xff]   ;;  %v3278_v15 = vld [vmem:[#allocation3 + $0x40] ss:$24 sps:$4 sm:$0xff]  }
  0xa5   :  { %v177_v49 = vsel %vm126_vm5, %v174_v46, %v175_v38  ;;  %v173_v52 = vpop.permute.xlu0 %172  ;;  %v3268_v53 = vld [vmem:[#allocation3 + $0x3c] ss:$24 sps:$4 sm:$0xff]   ;;  %v3270_v54 = vld [vmem:[#allocation3 + $0x38] ss:$24 sps:$4 sm:$0xff]  }
  0xa6   :  { %v179_v51 = vsel %vm178_vm14, %v169_v41, %v177_v49  ;;  %v176_v55 = vrot.slane %v173_v52, 4  ;;  %646 = vmatprep.subr.bf16.mxu1 %v3268_v53  ;;  %v3293_v48 = vld [vmem:[%s4280_s3 + $0x170] ss:$8 sps:$4 sm:$0xff]   ;;  %v3292_v53 = vld [vmem:[%s4280_s3 + $0x54] ss:$8 sps:$4 sm:$0xff]  }
  0xa7   :  { %v221_v45 = vpop.permute.xlu1 %220  ;;  %186 = vst [vmem:[#allocation3 + $0x18] sm:$0x33] %v179_v51  ;;  %647 = vmatpush1.bf16.msra.mxu1 %v3270_v54  ;;  %v3295_v51 = vld [vmem:[%s4280_s3 + $0x174] ss:$8 sps:$4 sm:$0xff]   ;;  %v3301_v54 = vld [vmem:[%s4280_s3 + $0x164] ss:$8 sps:$4 sm:$0xff]  }
  0xa8   :  { %v224_v47 = vrot.slane %v221_v45, 4  ;;  %v180_v56 = vsel %vm126_vm5, %v175_v38, %v176_v55  ;;  %v182_v57 = vsel %vm178_vm14, %v173_v52, %v176_v55  ;;  %v3299_v55 = vld [vmem:[%s4280_s3 + $0x160] ss:$8 sps:$4 sm:$0xff]  }
  0xa9   :  { %v181_v58 = vsel %vm178_vm14, %v171_v27, %v180_v56  ;;  %188 = vst.msk [vmem:[#allocation3 + $0x28] sm:$0x33] %vm3593_vm2, %v182_v57  ;;  %v219_v59 = vpop.permute.xlu0 %218  ;;  %v475_v2 = vld [vmem:[#allocation3] sm:$0xff]  ;;  %v3290_v56 = vld [vmem:[%s4280_s3 + $0x50] ss:$8 sps:$4 sm:$0xff]   ;;  %vm4021_vm2 = vmor %vm1478_vm1, %vm126_vm5 }
  0xaa   :  { %v230_v50 = vsel %vm226_vm13, %v221_v45, %v224_v47  ;;  %187 = vst [vmem:[#allocation3 + $0x20] sm:$0x33] %v181_v58  ;;  %v223_v60 = vrot.slane %v219_v59, 4  ;;  %v3289_v45 = vld [vmem:[%s4280_s3 + $0x64] ss:$8 sps:$4 sm:$0xff]  }
  0xab   :  { %236 = vst.msk [vmem:[#allocation3 + $0x28] sm:$0xcc] %vm3649_vm10, %v230_v50  ;;  %v3287_v50 = vld [vmem:[%s4280_s3 + $0x60] ss:$8 sps:$4 sm:$0xff]   ;;  %v3307_v57 = vld [vmem:[%s4280_s3 + $0x154] ss:$8 sps:$4 sm:$0xff]  }
  0xac   :  { %v225_v62 = vsel %vm126_vm5, %v222_v61, %v223_v60  ;;  %v228_v63 = vsel %vm126_vm5, %v223_v60, %v224_v47  ;;  %v3298_v58 = vld [vmem:[%s4280_s3 + $0x44] ss:$8 sps:$4 sm:$0xff]   ;;  %v3296_v61 = vld [vmem:[%s4280_s3 + $0x40] ss:$8 sps:$4 sm:$0xff]   ;;  %vm3495_vm10 = vmmov 0  }
  0xad   :  { %v227_v0 = vsel %vm226_vm13, %v217_v33, %v225_v62  ;;  %v229_v1 = vsel %vm226_vm13, %v219_v59, %v228_v63  ;;  %v3305_v59 = vld [vmem:[%s4280_s3 + $0x150] ss:$8 sps:$4 sm:$0xff]   ;;  %v3313_v60 = vld [vmem:[%s4280_s3 + $0x144] ss:$8 sps:$4 sm:$0xff]   ;;  %v3304_v62 = vld [vmem:[%s4280_s3 + $0x34] ss:$8 sps:$4 sm:$0xff]  }
  0xae   :  { %234 = vst [vmem:[#allocation3 + $0x18] sm:$0xcc] %v227_v0  ;;  %235 = vst [vmem:[#allocation3 + $0x20] sm:$0xcc] %v229_v1  ;;  %v3311_v63 = vld [vmem:[%s4280_s3 + $0x140] ss:$8 sps:$4 sm:$0xff]  }
  0xaf   :  { %v3302_v0 = vld [vmem:[%s4280_s3 + $0x30] ss:$8 sps:$4 sm:$0xff]   ;;  %v3319_v1 = vld [vmem:[%s4280_s3 + $0x134] ss:$8 sps:$4 sm:$0xff]  }
  0xb2   :  { %v3283_v16 = vld [vmem:[#allocation3 + $0x14] ss:$24 sps:$4 sm:$0xff]   ;;  %v3281_v17 = vld [vmem:[#allocation3 + $0x10] ss:$24 sps:$4 sm:$0xff]  }
  0xb5   :  { %v478_v4 = vld [vmem:[#allocation3 + $0x18] sm:$0xff]  ;;  %v3273_v9 = vld [vmem:[#allocation3 + $0xc] ss:$24 sps:$4 sm:$0xff]   ;;  %v3275_v8 = vld [vmem:[#allocation3 + $0x8] ss:$24 sps:$4 sm:$0xff]  }
  0xb6   :  { %v3271_v6 = vld [vmem:[#allocation3 + $0x4] ss:$24 sps:$4 sm:$0xff]   ;;  %v2876_v7 = vcombine.low %v475_v2, %v478_v4  ;;  %648 = vmatprep.subr.bf16.mxu1 %v3273_v9  ;;  %v494_v19 = vpop.permute.xlu0 %493  ;;  %v3308_v4 = vld [vmem:[%s4280_s3 + $0x20] ss:$8 sps:$4 sm:$0xff]  }
  0xb7   :  { %607 = vmatprep.subr.bf16.mxu0 %v3271_v6  ;;  %649 = vmatpush1.bf16.msra.mxu1 %v3275_v8  ;;  %v3310_v2 = vld [vmem:[%s4280_s3 + $0x24] ss:$8 sps:$4 sm:$0xff]   ;;  %v3316_v9 = vld [vmem:[%s4280_s3 + $0x14] ss:$8 sps:$4 sm:$0xff]   ;;  %v3314_v8 = vld [vmem:[%s4280_s3 + $0x10] ss:$8 sps:$4 sm:$0xff]  }
  0xb8   :  { %608 = vmatpush1.bf16.msra.mxu0 %v2876_v7  ;;  %1297 = vmatprep.subr.bf16.mxu1 %v3286_v43  ;;  %v3325_v6 = vld [vmem:[%s4280_s3 + $0x124] ss:$8 sps:$4 sm:$0xff]   ;;  %v3323_v7 = vld [vmem:[%s4280_s3 + $0x120] ss:$8 sps:$4 sm:$0xff]  }
  0xb9   :  { %2898 = vmatprep.subr.msk.bf16.mxu0 %vm86_vm0, %v2893_v10  ;;  %v3331_v10 = vld [vmem:[%s4280_s3 + $0x114] ss:$8 sps:$4 sm:$0xff]   ;;  %v3359_v43 = vld [vmem:[%s4280_s3 + $0x1c0] ss:$8 sps:$4 sm:$0xff]   ;;  %vm1286_vm0 = vcmask 64512  }
  0xba   :  { %2897 = vmatmul.mubr.msk.bf16.vlgmr.msra.gmra.mxu1 %vm571_vm15, %v474_v12 }
  0xbb   :  { %2895 = vmatmul.mubr.msk.bf16.vlgmr.msra.gmra.mxu0 %vm571_vm15, %v474_v12  ;;  %1298 = vmatpush1.bf16.msra.mxu1 %v3284_v42  ;;  %v3352_v42 = vld [vmem:[%s4280_s3 + $0xb4] ss:$8 sps:$4 sm:$0xff]  }
  0xbc   :  { %686 = vmatpush1.bf16.msra.mxu0 %v588_v13  ;;  %707 = vmatprep.mubr.bf16.mxu0 %v3488_v22  ;;  %v3320_v13 = vld [vmem:[%s4280_s3] ss:$8 sps:$4 sm:$0xff]  }
  0xbd   :  { %687 = vmatprep.subr.bf16.mxu0 %v3280_v14  ;;  %1299 = vmatprep.subr.bf16.mxu1 %v3289_v45  ;;  %v3337_v14 = vld [vmem:[%s4280_s3 + $0x104] ss:$8 sps:$4 sm:$0xff]  }
  0xbe   :  { %v3358_v45 = vld [vmem:[%s4280_s3 + $0xa4] ss:$8 sps:$4 sm:$0xff]  }
  0xbf   :  { %1300 = vmatpush1.bf16.msra.mxu1 %v3287_v50  ;;  %v3364_v50 = vld [vmem:[%s4280_s3 + $0x94] ss:$8 sps:$4 sm:$0xff]  }
  0xc0   :  { %688 = vmatpush1.bf16.msra.mxu0 %v3278_v15  ;;  %1301 = vmatprep.subr.bf16.mxu1 %v3292_v53  ;;  %v3328_v15 = vld [vmem:[%s4280_s3 + $0xf4] ss:$8 sps:$4 sm:$0xff]  }
  0xc1   :  { %689 = vmatprep.subr.bf16.mxu0 %v3283_v16  ;;  %v3335_v16 = vld [vmem:[%s4280_s3 + $0x100] ss:$8 sps:$4 sm:$0xff]  }
  0xc3   :  { %1302 = vmatpush1.bf16.msra.mxu1 %v3290_v56  ;;  %v3370_v56 = vld [vmem:[%s4280_s3 + $0x84] ss:$8 sps:$4 sm:$0xff]  }
  0xc4   :  { %690 = vmatpush1.bf16.msra.mxu0 %v3281_v17  ;;  %1303 = vmatprep.subr.bf16.mxu1 %v3298_v58  ;;  %v3326_v17 = vld [vmem:[%s4280_s3 + $0xf0] ss:$8 sps:$4 sm:$0xff]   ;;  %v3371_v58 = vld [vmem:[%s4280_s3 + $0x1a0] ss:$8 sps:$4 sm:$0xff]  }
  0xc5   :  { %1338 = vmatprep.subr.bf16.mxu0 %v3295_v51  ;;  %v3367_v51 = vld [vmem:[%s4280_s3 + $0x1b4] ss:$8 sps:$4 sm:$0xff]  }
  0xc7   :  { %2899 = vmatmul.mubr.msk.bf16.vlgmr.msra.gmra.mxu0 %vm571_vm15, %v474_v12  ;;  %1304 = vmatpush1.bf16.msra.mxu1 %v3296_v61  ;;  %v3329_v12 = vld [vmem:[%s4280_s3 + $0x110] ss:$8 sps:$4 sm:$0xff]  }
  0xc8   :  { %1339 = vmatpush1.bf16.msra.mxu0 %v3293_v48  ;;  %1305 = vmatprep.subr.bf16.mxu1 %v3304_v62  ;;  %v3356_v48 = vld [vmem:[%s4280_s3 + $0xa0] ss:$8 sps:$4 sm:$0xff]  }
  0xc9   :  { %1340 = vmatprep.subr.bf16.mxu0 %v3301_v54 }
  0xcb   :  { %1306 = vmatpush1.bf16.msra.mxu1 %v3302_v0  ;;  %v3376_v0 = vld [vmem:[%s4280_s3 + $0x274] ss:$8 sps:$4 sm:$0xff]  }
  0xcc   :  { %1341 = vmatpush1.bf16.msra.mxu0 %v3299_v55  ;;  %1307 = vmatprep.subr.bf16.mxu1 %v3310_v2 }
  0xcd   :  { %1342 = vmatprep.subr.bf16.mxu0 %v3307_v57  ;;  %v3368_v57 = vld [vmem:[%s4280_s3 + $0x80] ss:$8 sps:$4 sm:$0xff]  }
  0xcf   :  { %1308 = vmatpush1.bf16.msra.mxu1 %v3308_v4  ;;  %v3377_v4 = vld [vmem:[%s4280_s3 + $0x190] ss:$8 sps:$4 sm:$0xff]  }
  0xd0   :  { %1343 = vmatpush1.bf16.msra.mxu0 %v3305_v59  ;;  %1309 = vmatprep.subr.bf16.mxu1 %v3316_v9  ;;  %v3373_v59 = vld [vmem:[%s4280_s3 + $0x1a4] ss:$8 sps:$4 sm:$0xff]  }
  0xd1   :  { %1344 = vmatprep.subr.bf16.mxu0 %v3313_v60 }
  0xd3   :  { %1310 = vmatpush1.bf16.msra.mxu1 %v3314_v8 }
  0xd4   :  { %1345 = vmatpush1.bf16.msra.mxu0 %v3311_v63  ;;  %1311 = vmatprep.subr.bf16.mxu1 %v3322_v11 }
  0xd5   :  { %1346 = vmatprep.subr.bf16.mxu0 %v3319_v1  ;;  %v3379_v1 = vld [vmem:[%s4280_s3 + $0x194] ss:$8 sps:$4 sm:$0xff]  }
  0xd7   :  { %1312 = vmatpush1.bf16.msra.mxu1 %v3320_v13 }
  0xd8   :  { %1347 = vmatpush1.bf16.msra.mxu0 %v3317_v3  ;;  %1313 = vmatprep.subr.bf16.mxu1 %v3328_v15 }
  0xd9   :  { %1348 = vmatprep.subr.bf16.mxu0 %v3325_v6 }
  0xdb   :  { %1314 = vmatpush2.bf16.msra.mxu1 %v3326_v17 }
  0xdc   :  { %1349 = vmatpush1.bf16.msra.mxu0 %v3323_v7 }
  0xdd   :  { %1350 = vmatprep.subr.bf16.mxu0 %v3331_v10  ;;  %v3383_v10 = vld [vmem:[%s4280_s3 + $0x180] ss:$8 sps:$4 sm:$0xff]  }
  0xe0   :  { %1351 = vmatpush1.bf16.msra.mxu0 %v3329_v12 }
  0xe1   :  { %1352 = vmatprep.subr.bf16.mxu0 %v3337_v14 }
  0xe4   :  { %1353 = vmatpush1.bf16.msra.mxu0 %v3335_v16 }
 0x17a   :  { %v668_v20 = vpop.f32.mrf.mxu1 }
 0x17b   :  { %v627_v18 = vpop.f32.mrf.mxu0  ;;  %v3700_v21 = vadd.f32 %v668_v20, %v494_v19  ;;  %v3341_v20 = vld [vmem:[%s4280_s3 + $0x1f0] ss:$8 sps:$4 sm:$0xff]  }
 0x17c   :  { %v670_v25 = vpop.f32.mrf.mxu1  ;;  %v3707_v29 = vadd.f32 %v627_v18, %v494_v19  ;;  %v3343_v18 = vld [vmem:[%s4280_s3 + $0x1f4] ss:$8 sps:$4 sm:$0xff]  }
 0x17d   :  { %v629_v23 = vpop.f32.mrf.mxu0  ;;  %v718_v26 = vmax.f32 %v3700_v21, 0.0  ;;  %v3705_v27 = vadd.f32 %v670_v25, %v494_v19  ;;  %1354 = vmatprep.subr.bf16.mxu0 %v3343_v18  ;;  %v3349_v25 = vld [vmem:[%s4280_s3 + $0x1e4] ss:$8 sps:$4 sm:$0xff]  }
 0x17e   :  { %v3702_v24 = vadd.f32 %v629_v23, %v494_v19  ;;  %v672_v31 = vpop.f32.mrf.mxu1  ;;  %v716_v36 = vmax.f32 %v3707_v29, 0.0  ;;  %v3332_v23 = vld [vmem:[%s4280_s3 + $0xe0] ss:$8 sps:$4 sm:$0xff]   ;;  %1355 = vmatpush2.bf16.msra.mxu0 %v3341_v20  ;;  %v3385_v29 = vld [vmem:[%s4280_s3 + $0x184] ss:$8 sps:$4 sm:$0xff]  }
 0x17f   :  { %v631_v28 = vpop.f32.mrf.mxu0  ;;  %v719_v34 = vmax.f32 %v3705_v27, 0.0  ;;  %v3347_v31 = vld [vmem:[%s4280_s3 + $0x1e0] ss:$8 sps:$4 sm:$0xff]   ;;  %1356 = vmatprep.subr.bf16.mxu0 %v3349_v25  ;;  %v3382_v25 = vld [vmem:[%s4280_s3 + $0x264] ss:$8 sps:$4 sm:$0xff]  }
 0x180   :  { %v717_v30 = vmax.f32 %v3702_v24, 0.0  ;;  %v673_v35 = vpop.f32.mrf.mxu1  ;;  %v3340_v28 = vld [vmem:[%s4280_s3 + $0xd4] ss:$8 sps:$4 sm:$0xff]  }
 0x181   :  { %v632_v32 = vpop.f32.mrf.mxu0  ;;  %v3225_v37 = vpack.i.bf16 %v716_v36, %v719_v34  ;;  %v3346_v35 = vld [vmem:[%s4280_s3 + $0xc4] ss:$8 sps:$4 sm:$0xff]  }
 0x182   :  { %v3220_v33 = vpack.i.bf16 %v718_v26, %v717_v30  ;;  %v3338_v32 = vld [vmem:[%s4280_s3 + $0xd0] ss:$8 sps:$4 sm:$0xff]   ;;  %1357 = vmatpush2.bf16.msra.mxu0 %v3347_v31 }
 0x184   :  { %3221 = vrot.lane.b32.xlu1 %v3220_v33, %s3485_s22  ;;  %v3355_v33 = vld [vmem:[%s4280_s3 + $0x1d4] ss:$8 sps:$4 sm:$0xff]  }
 0x185   :  { %1358 = vmatprep.subr.bf16.mxu0 %v3355_v33 }
 0x187   :  { %v709_v38 = vpop.f32.mrf.mxu0 }
 0x188   :  { %v3721_v39 = vadd.f32 %v709_v38, %v494_v19  ;;  %3226 = vrot.lane.b32.xlu1 %v3225_v37, %s3485_s22  ;;  %v3353_v37 = vld [vmem:[%s4280_s3 + $0x1d0] ss:$8 sps:$4 sm:$0xff]   ;;  %v3344_v38 = vld [vmem:[%s4280_s3 + $0xc0] ss:$8 sps:$4 sm:$0xff]  }
 0x189   :  { %v711_v40 = vpop.f32.mrf.mxu0  ;;  %1359 = vmatpush2.bf16.msra.mxu0 %v3353_v37 }
 0x18a   :  { %v3724_v41 = vadd.f32 %v711_v40, %v494_v19  ;;  %v720_v46 = vmax.f32 %v3721_v39, 0.0  ;;  %v3334_v19 = vld [vmem:[%s4280_s3 + $0xe4] ss:$8 sps:$4 sm:$0xff]  }
 0x18b   :  { %v713_v44 = vpop.f32.mrf.mxu0  ;;  %1315 = vmatprep.subr.bf16.mxu1 %v3334_v19  ;;  %v3361_v40 = vld [vmem:[%s4280_s3 + $0x1c4] ss:$8 sps:$4 sm:$0xff]  }
 0x18c   :  { %v721_v47 = vmax.f32 %v3724_v41, 0.0  ;;  %1316 = vmatpush2.bf16.msra.mxu1 %v3332_v23  ;;  %v3350_v44 = vld [vmem:[%s4280_s3 + $0xb0] ss:$8 sps:$4 sm:$0xff]   ;;  %1360 = vmatprep.subr.bf16.mxu0 %v3361_v40  ;;  %v3388_v40 = vld [vmem:[%s4280_s3 + $0x254] ss:$8 sps:$4 sm:$0xff]  }
 0x18d   :  { %v714_v49 = vpop.f32.mrf.mxu0  ;;  %1317 = vmatprep.subr.bf16.mxu1 %v3340_v28  ;;  %1361 = vmatpush2.bf16.msra.mxu0 %v3359_v43 }
 0x18e   :  { %v3230_v52 = vpack.i.bf16 %v721_v47, %v720_v46  ;;  %v3362_v49 = vld [vmem:[%s4280_s3 + $0x90] ss:$8 sps:$4 sm:$0xff]   ;;  %1362 = vmatprep.subr.bf16.mxu0 %v3367_v51  ;;  %v3394_v51 = vld [vmem:[%s4280_s3 + $0x234] ss:$8 sps:$4 sm:$0xff]  }
 0x190   :  { %3231 = vrot.lane.b32.xlu0 %v3230_v52, %s3485_s22  ;;  %1318 = vmatpush2.bf16.msra.mxu1 %v3338_v32  ;;  %v3365_v52 = vld [vmem:[%s4280_s3 + $0x1b0] ss:$8 sps:$4 sm:$0xff]  }
 0x191   :  { %1319 = vmatprep.subr.bf16.mxu1 %v3346_v35  ;;  %1363 = vmatpush2.bf16.msra.mxu0 %v3365_v52  ;;  %v3380_v35 = vld [vmem:[%s4280_s3 + $0x260] ss:$8 sps:$4 sm:$0xff]   ;;  %v3392_v52 = vld [vmem:[%s4280_s3 + $0x230] ss:$8 sps:$4 sm:$0xff]  }
 0x192   :  { %1364 = vmatprep.subr.bf16.mxu0 %v3373_v59  ;;  %v3401_v59 = vld [vmem:[%s4280_s3 + $0x200] ss:$8 sps:$4 sm:$0xff]  }
 0x194   :  { %1320 = vmatpush2.bf16.msra.mxu1 %v3344_v38 }
 0x195   :  { %1321 = vmatprep.subr.bf16.mxu1 %v3352_v42  ;;  %1365 = vmatpush2.bf16.msra.mxu0 %v3371_v58  ;;  %v880_v58 = vld [vmem:[%s4280_s3 + $0x280] sm:$0xff] }
 0x196   :  { %1366 = vmatprep.subr.bf16.mxu0 %v3379_v1 }
 0x198   :  { %1322 = vmatpush2.bf16.msra.mxu1 %v3350_v44 }
 0x199   :  { %1323 = vmatprep.subr.bf16.mxu1 %v3358_v45  ;;  %1367 = vmatpush2.bf16.msra.mxu0 %v3377_v4  ;;  %v3386_v45 = vld [vmem:[%s4280_s3 + $0x250] ss:$8 sps:$4 sm:$0xff]  }
 0x19a   :  { %1368 = vmatprep.subr.bf16.mxu0 %v3385_v29 }
 0x19c   :  { %1324 = vmatpush2.bf16.msra.mxu1 %v3356_v48 }
 0x19d   :  { %1325 = vmatprep.subr.bf16.mxu1 %v3364_v50  ;;  %1369 = vmatpush2.bf16.msra.mxu0 %v3383_v10  ;;  %v3389_v50 = vld [vmem:[%s4280_s3 + $0x240] ss:$8 sps:$4 sm:$0xff]  }
 0x1a0   :  { %1326 = vmatpush2.bf16.msra.mxu1 %v3362_v49  ;;  %v3391_v49 = vld [vmem:[%s4280_s3 + $0x244] ss:$8 sps:$4 sm:$0xff]  }
 0x1a1   :  { %1327 = vmatprep.subr.bf16.mxu1 %v3370_v56  ;;  %v3398_v56 = vld [vmem:[%s4280_s3 + $0x210] ss:$8 sps:$4 sm:$0xff]  }
 0x1a4   :  { %1328 = vmatpush2.bf16.msra.mxu1 %v3368_v57  ;;  %v3403_v57 = vld [vmem:[%s4280_s3 + $0x204] ss:$8 sps:$4 sm:$0xff]  }
 0x1a5   :  { %1379 = vmatprep.subr.bf16.mxu1 %v3376_v0 }
 0x1f6   :  { %v3222_v53 = vpop.permute.xlu1 %3221 }
 0x1f7   :  { %v3224_v54 = vunpack.i.h.bf16 %v3222_v53  ;;  %v3223_v55 = vunpack.i.l.bf16 %v3222_v53  ;;  %v3397_v53 = vld [vmem:[%s4280_s3 + $0x224] ss:$8 sps:$4 sm:$0xff]  }
 0x1f9   :  { %v742_v60 = vsel %vm128_vm11, %v3223_v55, %v3224_v54 }
 0x1fa   :  { %v3227_v61 = vpop.permute.xlu1 %3226  ;;  %v753_v9 = vmax.f32 %v717_v30, %v742_v60  ;;  %v2980_v60 = vcombine.low %v880_v58, %v880_v58 }
 0x1fb   :  { %v3229_v62 = vunpack.i.h.bf16 %v3227_v61  ;;  %v3228_v63 = vunpack.i.l.bf16 %v3227_v61  ;;  %v2981_v61 = vcombine.high %v880_v58, %v880_v58 }
 0x1fc   :  { %v1292_v0 = vsel %vm126_vm5, %v2980_v60, 0 }
 0x1fd   :  { %v743_v2 = vsel %vm128_vm11, %v3224_v54, %v3228_v63  ;;  %v741_v3 = vsel %vm128_vm11, %v3229_v62, %v3223_v55  ;;  %v3395_v54 = vld [vmem:[%s4280_s3 + $0x220] ss:$8 sps:$4 sm:$0xff]   ;;  %v3400_v55 = vld [vmem:[%s4280_s3 + $0x214] ss:$8 sps:$4 sm:$0xff]  }
 0x1fe   :  { %v752_v6 = vmax.f32 %v716_v36, %v741_v3  ;;  %v754_v7 = vmax.f32 %v718_v26, %v743_v2 }
 0x200   :  { %764 = vrot.lane.b32.xlu0 %v752_v6, %s3487_s27  ;;  %v3235_v8 = vpack.i.bf16 %v754_v7, %v753_v9 }
 0x202   :  { %v3232_v36 = vpop.permute.xlu0 %3231  ;;  %3236 = vrot.lane.b32.xlu1 %v3235_v8, %s3487_s27 }
 0x203   :  { %v3234_v24 = vunpack.i.h.bf16 %v3232_v36  ;;  %v3233_v21 = vunpack.i.l.bf16 %v3232_v36 }
 0x205   :  { %v757_v26 = vmax.f32 %v721_v47, %v3234_v24  ;;  %v744_v30 = vsel %vm128_vm11, %v3228_v63, %v3233_v21  ;;  %v745_v11 = vsel %vm128_vm11, %v3233_v21, %v3234_v24 }
 0x206   :  { %v755_v12 = vmax.f32 %v719_v34, %v744_v30  ;;  %v3947_v13 = vmax.f32 %v720_v46, %v745_v11  ;;  %v3374_v46 = vld [vmem:[%s4280_s3 + $0x270] ss:$8 sps:$4 sm:$0xff]  }
 0x207   :  { %774 = vrot.lane.b32.xlu0 %v757_v26, %s3487_s27 }
 0x208   :  { %v3240_v14 = vpack.i.bf16 %v3947_v13, %v755_v12 }
 0x20a   :  { %3241 = vrot.lane.b32.xlu1 %v3240_v14, %s3487_s27 }
 0x272   :  { %v765_v41 = vpop.permute.xlu0 %764 }
 0x274   :  { %v3237_v15 = vpop.permute.xlu1 %3236 }
 0x275   :  { %v3239_v47 = vunpack.i.h.bf16 %v3237_v15  ;;  %v3238_v16 = vunpack.i.l.bf16 %v3237_v15 }
 0x277   :  { %v777_v17 = vsel %vm226_vm13, %v765_v41, %v3238_v16  ;;  %v778_v18 = vsel %vm226_vm13, %v3238_v16, %v3239_v47 }
 0x278   :  { %v788_v27 = vmax.f32 %v752_v6, %v777_v17  ;;  %v789_v34 = vmax.f32 %v753_v9, %v778_v18 }
 0x279   :  { %v775_v19 = vpop.permute.xlu0 %774 }
 0x27a   :  { %v793_v39 = vmax.f32 %v757_v26, %v775_v19  ;;  %v795_v20 = vpack.c.bf16 %v789_v34, %v789_v34  ;;  %v794_v23 = vpack.c.bf16 %v788_v27, %v788_v27 }
 0x27c   :  { %v799_v28 = vpack.c.bf16 %v793_v39, %v793_v39  ;;  %v3242_v31 = vpop.permute.xlu1 %3241  ;;  %1329 = vmatprep.mubr.bf16.mxu1 %v795_v20 }
 0x27d   :  { %v3244_v32 = vunpack.i.h.bf16 %v3242_v31  ;;  %v3243_v33 = vunpack.i.l.bf16 %v3242_v31  ;;  %1330 = vmatmul.mubr.bf16.vlgmr.msra.gmra.mxu1 %v794_v23 }
 0x27e   :  { %1380 = vmatpush1.bf16.msra.mxu1 %v3374_v46  ;;  %2983 = vmatprep.mubr.msk.bf16.mxu1 %vm1286_vm0, %v799_v28  ;;  %v1433_v46 = vld [vmem:[%s4281_s4] sm:$0xff]  ;;  %s3489_s4 = smov 106  }
 0x27f   :  { %v779_v37 = vsel %vm226_vm13, %v3239_v47, %v3243_v33  ;;  %1381 = vmatprep.subr.bf16.mxu1 %v3382_v25  ;;  %v780_v38 = vsel %vm226_vm13, %v3243_v33, %v3244_v32  ;;  %v781_v62 = vsel %vm226_vm13, %v3244_v32, %v775_v19  ;;  %v1437_v25 = vld [vmem:[%s4282_s5] sm:$0xff]  ;;  %v1456_v32 = vsub.s32 0, %v3589_v5  ;;  %s3490_s5 = smov 117  }
 0x280   :  { %v790_v42 = vmax.f32 %v754_v7, %v779_v37  ;;  %v791_v43 = vmax.f32 %v755_v12, %v780_v38  ;;  %v792_v63 = vmax.f32 %v3947_v13, %v781_v62  ;;  %v1460_v33 = vsub.s32 1, %v3589_v5 }
 0x282   :  { %1382 = vmatpush1.bf16.msra.mxu1 %v3380_v35  ;;  %v797_v44 = vpack.c.bf16 %v791_v43, %v791_v43  ;;  %v796_v48 = vpack.c.bf16 %v790_v42, %v790_v42  ;;  %v798_v1 = vpack.c.bf16 %v792_v63, %v792_v63  ;;  %v1447_v35 = vld [vmem:[%s4283_s6] sm:$0x3]  ;;  %s3491_s6 = smov 107  }
 0x283   :  { %1383 = vmatprep.subr.bf16.mxu1 %v3388_v40  ;;  %v1457_v37 = vrot.slane %v1447_v35, %v1456_v32  ;;  %v1461_v38 = vrot.slane %v1447_v35, %v1460_v33  ;;  %v3422_v35 = vld [vmem:[%s4286_s9 + $0x28] sm:$0xff]  }
 0x284   :  { %1370 = vmatprep.mubr.bf16.mxu0 %v797_v44 }
 0x285   :  { %1371 = vmatmul.mubr.bf16.vlgmr.msra.gmra.mxu0 %v796_v48 }
 0x286   :  { %1384 = vmatpush1.bf16.msra.mxu1 %v3386_v45  ;;  %1653 = vmatprep.mubr.bf16.mxu0 %v3488_v22 }
 0x287   :  { %1385 = vmatprep.subr.bf16.mxu1 %v3391_v49 }
 0x28a   :  { %1386 = vmatpush1.bf16.msra.mxu1 %v3389_v50 }
 0x28b   :  { %1387 = vmatprep.subr.bf16.mxu1 %v3394_v51  ;;  %v3432_v51 = vld [vmem:[%s4286_s9 + $0x40] sm:$0xff]  }
 0x28e   :  { %1388 = vmatpush1.bf16.msra.mxu1 %v3392_v52  ;;  %v1560_v52 = vld [vmem:[%s4285_s8] sm:$0xff] }
 0x28f   :  { %1389 = vmatprep.subr.bf16.mxu1 %v3397_v53 }
 0x292   :  { %1390 = vmatpush1.bf16.msra.mxu1 %v3395_v54 }
 0x293   :  { %1391 = vmatprep.subr.bf16.mxu1 %v3400_v55 }
 0x296   :  { %1392 = vmatpush1.bf16.msra.mxu1 %v3398_v56 }
 0x297   :  { %1393 = vmatprep.subr.bf16.mxu1 %v3403_v57 }
 0x29a   :  { %1394 = vmatpush1.bf16.msra.mxu1 %v3401_v59 }
 0x29b   :  { %2982 = vmatprep.subr.msk.bf16.mxu1 %vm126_vm5, %v2981_v61 }
 0x29e   :  { %1410 = vmatpush2.bf16.msra.mxu1 %v1292_v0 }
 0x2a1   :  { %1412 = vmatmul.mubr.bf16.vlgmr.msra.gmra.mxu1 %v798_v1 }
 0x33d   :  { %v1331_v2 = vpop.f32.mrf.mxu1 }
 0x33f   :  { %v1333_v3 = vpop.f32.mrf.mxu1 }
 0x341   :  { %v1335_v4 = vpop.f32.mrf.mxu1 }
 0x343   :  { %v1336_v6 = vpop.f32.mrf.mxu1 }
 0x345   :  { %v1372_v9 = vpop.f32.mrf.mxu0 }
 0x346   :  { %v1373_v29 = vadd.f32 %v1372_v9, %v1331_v2 }
 0x347   :  { %v1374_v7 = vpop.f32.mrf.mxu0 }
 0x348   :  { %v1375_v24 = vadd.f32 %v1374_v7, %v1333_v3 }
 0x349   :  { %v1376_v8 = vpop.f32.mrf.mxu0 }
 0x34b   :  { %v1377_v10 = vpop.f32.mrf.mxu0 }
 0x361   :  { %v1413_v36 = vpop.f32.mrf.mxu1 }
 0x362   :  { %v1414_v21 = vadd.f32 %v1413_v36, %v1373_v29 }
 0x363   :  { %v1415_v26 = vpop.f32.mrf.mxu1 }
 0x364   :  { %v1416_v30 = vadd.f32 %v1415_v26, %v1375_v24  ;;  %v1423_v13 = vmul.f32 %v1414_v21, %v1414_v21 }
 0x365   :  { %v1417_v11 = vpop.f32.mrf.mxu1 }
 0x366   :  { %v1420_v12 = vadd.f32 %v1416_v30, %v1414_v21  ;;  %v1424_v14 = vmul.f32 %v1416_v30, %v1416_v30 }
 0x367   :  { %v1418_v15 = vpop.f32.mrf.mxu1 }
 0x368   :  { %1421 = vadd.xlane.f32.xlu1 %v1420_v12  ;;  %v1425_v41 = vadd.f32 %v1424_v14, %v1423_v13 }
 0x36a   :  { %1426 = vadd.xlane.f32.xlu0 %v1425_v41 }
 0x3f1   :  { %v1422_v47 = vpop.xlane.xlu1 %1421 }
 0x3f2   :  { %v1428_v16 = vmul.f32 0.0078125, %v1422_v47 }
 0x3f3   :  { %v1427_v17 = vpop.xlane.xlu0 %1426 }
 0x3f4   :  { %v1430_v18 = vmul.f32 %v1428_v16, %v1428_v16  ;;  %v1429_v27 = vmul.f32 0.0078125, %v1427_v17 }
 0x3f6   :  { %v1431_v34 = vsub.f32 %v1429_v27, %v1430_v18  ;;  %v1550_v18 = vld [vmem:[%s4284_s7] sm:$0xf]  ;;  %s2861_s7 = sshll.u32 %s3497_s1, 4  ;;  %s2862_s7 = int_to_ptr.vmem [resolvable:$true] %s2861_s7 }
 0x3f7   :  { %p3462_p1 = scmp.lt.s32.totalorder %s2862_s7, %s2862_s7 }
 0x3f8   :  { %v1432_v19 = vmax.f32 %v1431_v34, 0.0 }
 0x3fa   :  { %v1434_v39 = vadd.f32 1e-05, %v1432_v19 }
 0x3fc   :  { %3453 = vrsqrt.f32 %v1434_v39 }
 0x409   :  { %v3454_v20 = vpop.eup %3453 }
 0x40a   :  { %v1436_v23 = vmul.f32 %v3454_v20, %v1433_v46  ;;  %v3420_v20 = vld [vmem:[%s4286_s9 + $0x38] sm:$0xff]  }
 0x40c   :  { %1442 = vperm.xlu0 %3219, %v1436_v23   ;;  %v1438_v28 = vmul.f32 %v1436_v23, %v1428_v16 }
 0x40e   :  { %v1439_v31 = vsub.f32 %v1437_v25, %v1438_v28 }
 0x410   :  { %1450 = vperm.xlu1 %3245, %v1439_v31   ;;  %v3421_v31 = vld [vmem:[%s4286_s9 + $0x30] sm:$0xff]  }
 0x487   :  { %v1443_v40 = vpop.permute.xlu0 %1442 }
 0x488   :  { %v1445_v43 = vmul.f32 %v1443_v40, %v1414_v21  ;;  %v1446_v44 = vmul.f32 %v1443_v40, %v1416_v30  ;;  %v3425_v40 = vld [vmem:[%s4286_s9 + $0x10] sm:$0xff]  }
 0x48b   :  { %v1451_v42 = vpop.permute.xlu1 %1450 }
 0x48c   :  { %v1464_v45 = vmul.f32 %v1457_v37, %v1451_v42  ;;  %v1465_v48 = vmul.f32 %v1461_v38, %v1451_v42  ;;  %v3423_v37 = vld [vmem:[%s4286_s9 + $0x20] sm:$0xff]   ;;  %v3424_v38 = vld [vmem:[%s4286_s9 + $0x18] sm:$0xff]   ;;  %v3426_v42 = vld [vmem:[%s4286_s9 + $0x8] sm:$0xff]  }
 0x48e   :  { %v1466_v49 = vadd.f32 %v1464_v45, %v1445_v43  ;;  %v1467_v50 = vadd.f32 %v1465_v48, %v1446_v44  ;;  %v3427_v43 = vld [vmem:[%s4286_s9] sm:$0xff]   ;;  %v3429_v48 = vld [vmem:[%s4286_s9 + $0x58] sm:$0xff]  }
 0x48f   :  { %v3428_v44 = vld [vmem:[%s4286_s9 + $0x60] ss:$0 sps:$4 sm:$0xff]  }
 0x490   :  { %v3049_v5 = vpack.c.bf16 %v1467_v50, %v1466_v49  ;;  %v1793_v45 = vsel %vm126_vm5, %v3428_v44, 0  ;;  %v3430_v49 = vld [vmem:[%s4286_s9 + $0x50] sm:$0xff]   ;;  %v3431_v50 = vld [vmem:[%s4286_s9 + $0x48] sm:$0xff]   ;;  %s3457_s9 = scalar_lea.vmem %s2862_s7, 32 }
 0x491   :  { %v3445_v44 = vld [vmem:[%s4291_s14 + $0x8] sm:$0xff]   ;;  %p3458_p0 = scmp.ne.s32.totalorder %s2862_s7, %s3457_s9  ;;  %p3463_p2 = scmp.lt.s32.totalorder %s3457_s9, %s3457_s9 }
 0x492   :  { %1526 = vrot.lane.b32.xlu0 %v3049_v5, %s3482_s28  ;;  %1543 = vrot.lane.b32.xlu1 %v3049_v5, %s3489_s4  ;;  %1480 = vst.msk [vmem:[#allocation4] sm:$0xff] %vm4021_vm2, %v3049_v5 }
 0x493   :  { %p3464_p3 = por %p3463_p2, %p3462_p1 }
 0x495   :  { %p3465_p4 = pnand %p3464_p3, %p3458_p0 }
 0x496   :  { %1508 = vrot.lane.b32.xlu0 %v3049_v5, %s3490_s5  ;;  %1534 = vrot.lane.b32.xlu1 %v3049_v5, %s3491_s6 }
 0x49a   :  { %1491 = vrot.lane.b32.xlu0 %v3049_v5, %s3486_s26  ;;  %1517 = vrot.lane.b32.xlu1 %v3049_v5, %s3492_s25 }
 0x49e   :  { %1483 = vrot.lane.b32.xlu0 %v3049_v5, %s3485_s22  ;;  %1499 = vrot.lane.b32.xlu1 %v3049_v5, %s3493_s23 }
 0x4a2   :  { %1563 = vperm.xlu1 %3245, %v1560_v52  }
 0x504   :  { %v1527_v53 = vpop.permute.xlu0 %1526  ;;  %v1544_v54 = vpop.permute.xlu1 %1543 }
 0x505   :  { %v1528_v55 = vrot.slane %v1527_v53, 4  ;;  %v1545_v56 = vrot.slane %v1544_v54, 4 }
 0x507   :  { %v1529_v57 = vsel %vm321_vm7, %v1527_v53, %v1528_v55  ;;  %v1547_v58 = vsel %vm1546_vm3, %v1544_v54, %v1545_v56  ;;  %vm1520_vm7 = vcmask 949248  }
 0x508   :  { %1531 = vst.msk [vmem:[#allocation4 + $0x30] sm:$0xff] %vm4021_vm2, %v1529_v57  ;;  %1549 = vst.msk [vmem:[#allocation4 + $0x40] sm:$0xff] %vm4021_vm2, %v1547_v58  ;;  %v1509_v59 = vpop.permute.xlu0 %1508  ;;  %v1535_v61 = vpop.permute.xlu1 %1534 }
 0x509   :  { %v1510_v60 = vrot.slane %v1509_v59, 4  ;;  %v1536_v62 = vrot.slane %v1535_v61, 4 }
 0x50b   :  { %v1512_v63 = vsel %vm1511_vm4, %v1509_v59, %v1510_v60  ;;  %v1538_v0 = vsel %vm1537_vm6, %v1535_v61, %v1536_v62 }
 0x50c   :  { %1514 = vst.msk [vmem:[#allocation4 + $0x20] sm:$0xff] %vm4021_vm2, %v1512_v63  ;;  %1540 = vst.msk [vmem:[#allocation4 + $0x38] sm:$0xff] %vm4021_vm2, %v1538_v0  ;;  %v1492_v1 = vpop.permute.xlu0 %1491  ;;  %v1518_v2 = vpop.permute.xlu1 %1517 }
 0x50d   :  { %v1493_v3 = vrot.slane %v1492_v1, 4  ;;  %v1519_v4 = vrot.slane %v1518_v2, 4 }
 0x50f   :  { %v1494_v6 = vsel %vm178_vm14, %v1492_v1, %v1493_v3  ;;  %v1521_v9 = vsel %vm1520_vm7, %v1518_v2, %v1519_v4  ;;  %v1559_v7 = vld [vmem:[#allocation4 + $0x40] sm:$0xff] }
 0x510   :  { %1496 = vst.msk [vmem:[#allocation4 + $0x10] sm:$0xff] %vm4021_vm2, %v1494_v6  ;;  %1523 = vst.msk [vmem:[#allocation4 + $0x28] sm:$0xff] %vm4021_vm2, %v1521_v9  ;;  %v1484_v8 = vpop.permute.xlu0 %1483  ;;  %v1500_v10 = vpop.permute.xlu1 %1499  ;;  %v2994_v29 = vcombine.high %v1559_v7, %v1559_v7  ;;  %v2993_v36 = vcombine.low %v1559_v7, %v1559_v7 }
 0x511   :  { %v1485_v24 = vrot.slane %v1484_v8, 4  ;;  %v1501_v21 = vrot.slane %v1500_v10, 4 }
 0x512   :  { %2995 = vmatprep.subr.msk.bf16.mxu0 %vm126_vm5, %v2994_v29  ;;  %v1616_v26 = vsel %vm126_vm5, %v2993_v36, 0  ;;  %vm1835_vm5 = vcmask 261120  }
 0x513   :  { %v1486_v30 = vsel %vm128_vm11, %v1484_v8, %v1485_v24  ;;  %v1503_v11 = vsel %vm1502_vm8, %v1500_v10, %v1501_v21  ;;  %1628 = vmatpush1.bf16.msra.mxu0 %v1616_v26  ;;  %v3410_v12 = vld [vmem:[#allocation4 + $0x34] ss:$8 sps:$4 sm:$0xff]   ;;  %v3408_v13 = vld [vmem:[#allocation4 + $0x30] ss:$8 sps:$4 sm:$0xff]   ;;  %v3494_v8 = vmov 0.0  }
 0x514   :  { %1488 = vst.msk [vmem:[#allocation4 + $0x8] sm:$0xff] %vm4021_vm2, %v1486_v30  ;;  %1505 = vst.msk [vmem:[#allocation4 + $0x18] sm:$0xff] %vm4021_vm2, %v1503_v11  ;;  %1629 = vmatprep.subr.bf16.mxu0 %v3410_v12  ;;  %3088 = vmatprep.subr.bf16.mxu1 %v3494_v8  ;;  %v1848_v12 = vld [vmem:[%s4287_s10] sm:$0xff] }
 0x515   :  { %3090 = vmatprep.mubr.msk.bf16.mxu1 %vm3495_vm10, %v3494_v8 }
 0x517   :  { %1630 = vmatpush1.bf16.msra.mxu0 %v3408_v13  ;;  %v3413_v14 = vld [vmem:[#allocation4 + $0x24] ss:$8 sps:$4 sm:$0xff]   ;;  %v3411_v15 = vld [vmem:[#allocation4 + $0x20] ss:$8 sps:$4 sm:$0xff]  }
 0x518   :  { %1631 = vmatprep.subr.bf16.mxu0 %v3413_v14  ;;  %v3433_v13 = vld [vmem:[%s4289_s12] sm:$0xff]  }
 0x519   :  { %3089 = vmatpush3.bf16.msra.mxu1 %v3433_v13 }
 0x51a   :  { %3094 = vmatprep.subr.bf16.mxu1 %v3494_v8 }
 0x51b   :  { %1632 = vmatpush1.bf16.msra.mxu0 %v3411_v15  ;;  %v3416_v41 = vld [vmem:[#allocation4 + $0x14] ss:$8 sps:$4 sm:$0xff]   ;;  %v3414_v47 = vld [vmem:[#allocation4 + $0x10] ss:$8 sps:$4 sm:$0xff]   ;;  %v3419_v16 = vld [vmem:[#allocation4 + $0x4] ss:$8 sps:$4 sm:$0xff]  }
 0x51c   :  { %1633 = vmatprep.subr.bf16.mxu0 %v3416_v41  ;;  %v3417_v17 = vld [vmem:[#allocation4] ss:$8 sps:$4 sm:$0xff]  }
 0x51d   :  { %v1564_v27 = vpop.permute.xlu1 %1563  ;;  %v1852_v41 = vld [vmem:[%s4288_s11] sm:$0xff] }
 0x51f   :  { %1634 = vmatpush1.bf16.msra.mxu0 %v3414_v47 }
 0x520   :  { %1635 = vmatprep.subr.bf16.mxu0 %v3419_v16 }
 0x523   :  { %1636 = vmatpush1.bf16.msra.mxu0 %v3417_v17  ;;  %v3434_v17 = vld [vmem:[%s4289_s12 + $0x30] sm:$0xff]  }
 0x524   :  { %1795 = vmatprep.subr.bf16.mxu0 %v3488_v22 }
 0x526   :  { %2996 = vmatmul.mubr.msk.bf16.vlgmr.msra.gmra.mxu0 %vm1611_vm9, %v1550_v18 }
 0x527   :  { %1796 = vmatpush1.bf16.msra.mxu0 %v3420_v20 }
 0x528   :  { %1797 = vmatprep.subr.bf16.mxu0 %v3488_v22 }
 0x52b   :  { %1798 = vmatpush1.bf16.msra.mxu0 %v3421_v31  ;;  %v3436_v31 = vld [vmem:[%s4289_s12 + $0x10] sm:$0xff]  }
 0x52c   :  { %1799 = vmatprep.subr.bf16.mxu0 %v3488_v22 }
 0x52f   :  { %1800 = vmatpush1.bf16.msra.mxu0 %v3422_v35 }
 0x530   :  { %1801 = vmatprep.subr.bf16.mxu0 %v3488_v22 }
 0x533   :  { %1802 = vmatpush1.bf16.msra.mxu0 %v3423_v37  ;;  %v3437_v37 = vld [vmem:[%s4289_s12 + $0x18] sm:$0xff]  }
 0x534   :  { %1803 = vmatprep.subr.bf16.mxu0 %v3488_v22 }
 0x537   :  { %1804 = vmatpush1.bf16.msra.mxu0 %v3424_v38  ;;  %v3438_v38 = vld [vmem:[%s4289_s12 + $0x20] sm:$0xff]  }
 0x538   :  { %1805 = vmatprep.subr.bf16.mxu0 %v3488_v22 }
 0x53b   :  { %1806 = vmatpush1.bf16.msra.mxu0 %v3425_v40  ;;  %v3439_v40 = vld [vmem:[%s4289_s12 + $0x28] sm:$0xff]  }
 0x53c   :  { %1807 = vmatprep.subr.bf16.mxu0 %v3488_v22 }
 0x53f   :  { %1808 = vmatpush1.bf16.msra.mxu0 %v3426_v42  ;;  %v3440_v42 = vld [vmem:[%s4289_s12 + $0x38] sm:$0xff]  }
 0x540   :  { %1809 = vmatprep.subr.bf16.mxu0 %v3488_v22 }
 0x543   :  { %1810 = vmatpush1.bf16.msra.mxu0 %v3427_v43  ;;  %v3441_v43 = vld [vmem:[%s4289_s12] sm:$0xff]  }
 0x544   :  { %1817 = vmatprep.subr.bf16.mxu0 %v3488_v22 }
 0x547   :  { %1818 = vmatpush2.bf16.msra.mxu0 %v1793_v45  ;;  %v3442_v45 = vld [vmem:[%s4289_s12 + $0x10] sm:$0xff]  }
 0x548   :  { %1819 = vmatprep.subr.bf16.mxu0 %v3488_v22 }
 0x54b   :  { %1820 = vmatpush2.bf16.msra.mxu0 %v3429_v48 }
 0x54c   :  { %1821 = vmatprep.subr.bf16.mxu0 %v3488_v22 }
 0x54f   :  { %1822 = vmatpush2.bf16.msra.mxu0 %v3430_v49  ;;  %v3446_v49 = vld [vmem:[%s4291_s14] sm:$0xff]  }
 0x550   :  { %1823 = vmatprep.subr.bf16.mxu0 %v3488_v22 }
 0x553   :  { %1824 = vmatpush2.bf16.msra.mxu0 %v3431_v50  ;;  %v3443_v50 = vld [vmem:[%s4289_s12 + $0x20] sm:$0xff]  }
 0x554   :  { %1825 = vmatprep.subr.bf16.mxu0 %v3488_v22 }
 0x557   :  { %1826 = vmatpush2.bf16.msra.mxu0 %v3432_v51 }
 0x558   :  { %3124 = vmatprep.subr.bf16.mxu0 %v3494_v8 }
 0x5e6   :  { %v1655_v34 = vpop.f32.mrf.mxu0 }
 0x5e7   :  { %v1656_v19 = vadd.f32 %v1655_v34, %v1564_v27 }
 0x5e8   :  { %v1657_v39 = vpop.f32.mrf.mxu0 }
 0x5e9   :  { %v1658_v46 = vadd.f32 %v1657_v39, %v1564_v27  ;;  %v1662_v25 = vmax.f32 %v1656_v19, 0.0  ;;  %v3435_v39 = vld [vmem:[%s4289_s12 + $0x8] sm:$0xff]  }
 0x5ea   :  { %v1659_v23 = vpop.f32.mrf.mxu0 }
 0x5eb   :  { %v1663_v28 = vmax.f32 %v1658_v46, 0.0 }
 0x5ec   :  { %v1660_v32 = vpop.f32.mrf.mxu0 }
 0x5ed   :  { %v3246_v33 = vpack.i.bf16 %v1663_v28, %v1662_v25 }
 0x5ef   :  { %3247 = vrot.lane.b32.xlu0 %v3246_v33, %s3485_s22  ;;  %s3496_s22 = smov 112  }
 0x661   :  { %v3248_v5 = vpop.permute.xlu0 %3247 }
 0x662   :  { %v3250_v52 = vunpack.i.h.bf16 %v3248_v5  ;;  %v3249_v53 = vunpack.i.l.bf16 %v3248_v5  ;;  %v3444_v5 = vld [vmem:[%s4289_s12 + $0x30] sm:$0xff]  }
 0x664   :  { %v1674_v54 = vmax.f32 %v1663_v28, %v3250_v52  ;;  %v1670_v55 = vsel %vm128_vm11, %v3249_v53, %v3250_v52  ;;  %vm1877_vm11 = vcmask 130048  }
 0x665   :  { %v1673_v56 = vmax.f32 %v1662_v25, %v1670_v55 }
 0x667   :  { %v3251_v57 = vpack.i.bf16 %v1674_v54, %v1673_v56 }
 0x669   :  { %3252 = vrot.lane.b32.xlu1 %v3251_v57, %s3493_s23 }
 0x6db   :  { %v3253_v58 = vpop.permute.xlu1 %3252 }
 0x6dc   :  { %v3255_v59 = vunpack.i.h.bf16 %v3253_v58  ;;  %v3254_v61 = vunpack.i.l.bf16 %v3253_v58 }
 0x6de   :  { %v1686_v60 = vmax.f32 %v1674_v54, %v3255_v59  ;;  %v1682_v22 = vsel %vm1502_vm8, %v3254_v61, %v3255_v59 }
 0x6df   :  { %v1685_v62 = vmax.f32 %v1673_v56, %v1682_v22 }
 0x6e0   :  { %v1688_v63 = vpack.c.bf16 %v1686_v60, %v1686_v60 }
 0x6e1   :  { %v1687_v0 = vpack.c.bf16 %v1685_v62, %v1685_v62 }
 0x6e2   :  { %3010 = vmatprep.mubr.msk.bf16.mxu0 %vm1611_vm9, %v1688_v63 }
 0x6e3   :  { %1828 = vmatmul.mubr.bf16.vlgmr.msra.gmra.mxu0 %v1687_v0 }
 0x6e4   :  { %3126 = vmatprep.mubr.msk.bf16.mxu0 %vm3495_vm10, %v3494_v8  ;;  %3125 = vmatpush3.bf16.msra.mxu0 %v3434_v17 }
 0x6e5   :  { %3136 = vmatprep.subr.bf16.mxu0 %v3494_v8 }
 0x7a3   :  { %v1829_v1 = vpop.f32.mrf.mxu0 }
 0x7a4   :  { %v1836_v2 = vsel %vm1835_vm5, %v1829_v1, 0.0  ;;  %v1839_v3 = vmul.f32 %v1829_v1, %v1829_v1 }
 0x7a5   :  { %1837 = vadd.xlane.f32.xlu0 %v1836_v2  ;;  %v1831_v4 = vpop.f32.mrf.mxu0 }
 0x7a6   :  { %v1840_v6 = vsel %vm1835_vm5, %v1839_v3, 0.0 }
 0x7a7   :  { %1841 = vadd.xlane.f32.xlu1 %v1840_v6  ;;  %v1832_v9 = vpop.f32.mrf.mxu0 }
 0x7a9   :  { %v1833_v7 = vpop.f32.mrf.mxu0 }
 0x82e   :  { %v1838_v10 = vpop.xlane.xlu0 %1837 }
 0x82f   :  { %v1843_v29 = vmul.f32 0.03125, %v1838_v10  ;;  %v1867_v10 = vld [vmem:[%s4290_s13] sm:$0x1] }
 0x830   :  { %v1842_v36 = vpop.xlane.xlu1 %1841 }
 0x831   :  { %v1845_v24 = vmul.f32 %v1843_v29, %v1843_v29  ;;  %v1844_v21 = vmul.f32 0.03125, %v1842_v36 }
 0x833   :  { %v1846_v26 = vsub.f32 %v1844_v21, %v1845_v24 }
 0x835   :  { %v1847_v30 = vmax.f32 %v1846_v26, 0.0 }
 0x837   :  { %v1849_v11 = vadd.f32 1e-05, %v1847_v30 }
 0x839   :  { %3455 = vrsqrt.f32 %v1849_v11 }
 0x846   :  { %v3456_v14 = vpop.eup %3455 }
 0x847   :  { %v1851_v15 = vmul.f32 %v3456_v14, %v1848_v12 }
 0x849   :  { %1857 = vperm.xlu0 %3219, %v1851_v15   ;;  %v1853_v47 = vmul.f32 %v1851_v15, %v1843_v29 }
 0x84b   :  { %v1854_v16 = vsub.f32 %v1852_v41, %v1853_v47 }
 0x84d   :  { %1863 = vperm.xlu1 %3245, %v1854_v16  }
 0x8c4   :  { %v1858_v18 = vpop.permute.xlu0 %1857 }
 0x8c5   :  { %v1860_v27 = vmul.f32 %v1858_v18, %v1829_v1 }
 0x8c8   :  { %v1864_v34 = vpop.permute.xlu1 %1863 }
 0x8c9   :  { %v1866_v19 = vadd.f32 %v1864_v34, %v1860_v27 }
 0x8cb   :  { %v1868_v46 = vpack.c.bf16 %v1866_v19, %v1866_v19 }
 0x8cd   :  { %2362 = vrot.lane.b32.xlu0 %v1868_v46, %s3496_s22  ;;  %3091 = vmatmul.mubr.msk.bf16.vlgmr.msra.gmra.mxu1 %vm1877_vm11, %v1868_v46  ;;  %v2191_v20 = vrot.slane %v1868_v46, 3  ;;  %v1924_v23 = vshrl.u32 %v1868_v46, 16  ;;  %v1979_v25 = vrot.slane %v1868_v46, 1  ;;  %v2085_v32 = vrot.slane %v1868_v46, 2 }
 0x8ce   :  { %3095 = vmatpush3.bf16.msra.mxu1 %v3435_v39  ;;  %3096 = vmatprep.mubr.msk.bf16.mxu1 %vm3495_vm10, %v3494_v8 }
 0x8cf   :  { %3127 = vmatmul.mubr.msk.bf16.vlgmr.msra.gmra.mxu0 %vm1877_vm11, %v2191_v20  ;;  %2416 = vrot.lane.b32.xlu1 %v1924_v23, %s3496_s22  ;;  %v2032_v28 = vrot.slane %v1924_v23, 1  ;;  %v2138_v33 = vrot.slane %v1924_v23, 2  ;;  %v2244_v35 = vrot.slane %v1924_v23, 3 }
 0x8d0   :  { %3100 = vmatprep.subr.bf16.mxu1 %v3494_v8  ;;  %3140 = vmatprep.mubr.msk.bf16.mxu0 %vm3495_vm10, %v3494_v8 }
 0x8d1   :  { %2470 = vrot.lane.b32.xlu0 %v1979_v25, %s3496_s22  ;;  %3137 = vmatpush3.bf16.msra.mxu0 %v3445_v44 }
 0x8d2   :  { %3138 = vmatprep.subr.bf16.mxu0 %v3494_v8 }
 0x8d3   :  { %2524 = vrot.lane.b32.xlu1 %v2032_v28, %s3496_s22 }
 0x8d5   :  { %2578 = vrot.lane.b32.xlu0 %v2085_v32, %s3496_s22  ;;  %3097 = vmatmul.mubr.msk.bf16.vlgmr.msra.gmra.mxu1 %vm1877_vm11, %v1924_v23 }
 0x8d6   :  { %3101 = vmatpush3.bf16.msra.mxu1 %v3436_v31  ;;  %3102 = vmatprep.mubr.msk.bf16.mxu1 %vm3495_vm10, %v3494_v8 }
 0x8d7   :  { %2632 = vrot.lane.b32.xlu1 %v2138_v33, %s3496_s22  ;;  %3106 = vmatprep.subr.bf16.mxu1 %v3494_v8 }
 0x8d8   :  { %3139 = vmatpush3.bf16.msra.mxu0 %v3446_v49 }
 0x8d9   :  { %2686 = vrot.lane.b32.xlu0 %v2191_v20, %s3496_s22  ;;  %3150 = vmatprep.subr.bf16.mxu0 %v3494_v8  ;;  %v3447_v20 = vld [vmem:[%s4289_s12 + $0x8] sm:$0xff]  }
 0x8db   :  { %2740 = vrot.lane.b32.xlu1 %v2244_v35, %s3496_s22 }
 0x8dd   :  { %3103 = vmatmul.mubr.msk.bf16.vlgmr.msra.gmra.mxu1 %vm1877_vm11, %v1979_v25 }
 0x8de   :  { %3107 = vmatpush3.bf16.msra.mxu1 %v3437_v37  ;;  %3108 = vmatprep.mubr.msk.bf16.mxu1 %vm3495_vm10, %v3494_v8 }
 0x8df   :  { %3112 = vmatprep.subr.bf16.mxu1 %v3494_v8 }
 0x8e5   :  { %3109 = vmatmul.mubr.msk.bf16.vlgmr.msra.gmra.mxu1 %vm1877_vm11, %v2032_v28  ;;  %v3448_v28 = vld [vmem:[%s4289_s12 + $0x18] sm:$0xff]  }
 0x8e6   :  { %3113 = vmatpush3.bf16.msra.mxu1 %v3438_v38  ;;  %3114 = vmatprep.mubr.msk.bf16.mxu1 %vm3495_vm10, %v3494_v8 }
 0x8e7   :  { %3118 = vmatprep.subr.bf16.mxu1 %v3494_v8 }
 0x8ed   :  { %3115 = vmatmul.mubr.msk.bf16.vlgmr.msra.gmra.mxu1 %vm1877_vm11, %v2085_v32  ;;  %v3449_v32 = vld [vmem:[%s4289_s12 + $0x28] sm:$0xff]  }
 0x8ee   :  { %3119 = vmatpush3.bf16.msra.mxu1 %v3439_v40  ;;  %3120 = vmatprep.mubr.msk.bf16.mxu1 %vm3495_vm10, %v3494_v8 }
 0x8ef   :  { %3130 = vmatprep.subr.bf16.mxu1 %v3494_v8 }
 0x8f5   :  { %3121 = vmatmul.mubr.msk.bf16.vlgmr.msra.gmra.mxu1 %vm1877_vm11, %v2138_v33 }
 0x8f6   :  { %3131 = vmatpush3.bf16.msra.mxu1 %v3440_v42  ;;  %3132 = vmatprep.mubr.msk.bf16.mxu1 %vm3495_vm10, %v3494_v8 }
 0x8f7   :  { %3144 = vmatprep.subr.bf16.mxu1 %v3494_v8 }
 0x8fd   :  { %3133 = vmatmul.mubr.msk.bf16.vlgmr.msra.gmra.mxu1 %vm1877_vm11, %v2244_v35  ;;  %v3450_v35 = vld [vmem:[%s4289_s12 + $0x38] sm:$0xff]  }
 0x8fe   :  { %3145 = vmatpush3.bf16.msra.mxu1 %v3441_v43  ;;  %3146 = vmatprep.mubr.msk.bf16.mxu1 %vm3495_vm10, %v3494_v8 }
 0x8ff   :  { %3156 = vmatprep.subr.bf16.mxu1 %v3494_v8 }
 0x93f   :  { %v2363_v48 = vpop.permute.xlu0 %2362 }
 0x940   :  { %3147 = vmatmul.mubr.msk.bf16.vlgmr.msra.gmra.mxu1 %vm1877_vm11, %v2363_v48 }
 0x941   :  { %3157 = vmatpush3.bf16.msra.mxu1 %v3442_v45  ;;  %3158 = vmatprep.mubr.msk.bf16.mxu1 %vm3495_vm10, %v3494_v8  ;;  %v2417_v31 = vpop.permute.xlu1 %2416 }
 0x942   :  { %3168 = vmatprep.subr.bf16.mxu1 %v3494_v8 }
 0x943   :  { %v2471_v51 = vpop.permute.xlu0 %2470 }
 0x945   :  { %v2525_v33 = vpop.permute.xlu1 %2524 }
 0x947   :  { %v2579_v52 = vpop.permute.xlu0 %2578 }
 0x948   :  { %3159 = vmatmul.mubr.msk.bf16.vlgmr.msra.gmra.mxu1 %vm1877_vm11, %v2471_v51 }
 0x949   :  { %3169 = vmatpush3.bf16.msra.mxu1 %v3443_v50  ;;  %3170 = vmatprep.mubr.msk.bf16.mxu1 %vm3495_vm10, %v3494_v8  ;;  %v2633_v37 = vpop.permute.xlu1 %2632 }
 0x94a   :  { %3180 = vmatprep.subr.bf16.mxu1 %v3494_v8 }
 0x94b   :  { %v2687_v53 = vpop.permute.xlu0 %2686 }
 0x94d   :  { %v2741_v38 = vpop.permute.xlu1 %2740 }
 0x950   :  { %3171 = vmatmul.mubr.msk.bf16.vlgmr.msra.gmra.mxu1 %vm1877_vm11, %v2579_v52 }
 0x951   :  { %3181 = vmatpush3.bf16.msra.mxu1 %v3444_v5  ;;  %3182 = vmatprep.mubr.msk.bf16.mxu1 %vm3495_vm10, %v3494_v8 }
 0x952   :  { %3192 = vmatprep.subr.bf16.mxu1 %v3494_v8 }
 0x958   :  { %3183 = vmatmul.mubr.msk.bf16.vlgmr.msra.gmra.mxu1 %vm1877_vm11, %v2687_v53 }
 0x959   :  { %3196 = vmatprep.mubr.msk.bf16.mxu1 %vm3495_vm10, %v3494_v8 }
 0x98d   :  { %v1915_v54 = vpop.f32.mrf.mxu1 }
 0x98e   :  { %v1921_v24 = vadd.f32 %v1915_v54, %v1867_v10 }
 0x98f   :  { %v3092_v55 = vpop.f32.mrf.mxu1  ;;  %v2235_v56 = vpop.f32.mrf.mxu0 }
 0x991   :  { %v1918_v57 = vpop.f32.mrf.mxu1  ;;  %v3128_v58 = vpop.f32.mrf.mxu0 }
 0x992   :  { %v3451_v58 = vld [vmem:[%s4291_s14 + $0x8] sm:$0xff]  }
 0x993   :  { %v3093_v59 = vpop.f32.mrf.mxu1  ;;  %v2238_v61 = vpop.f32.mrf.mxu0  ;;  %3193 = vmatpush3.bf16.msra.mxu1 %v3451_v58 }
 0x994   :  { %3194 = vmatprep.subr.bf16.mxu1 %v3494_v8  ;;  %v3452_v59 = vld [vmem:[%s4291_s14] sm:$0xff]  }
 0x995   :  { %v1969_v60 = vpop.f32.mrf.mxu1  ;;  %v3129_v22 = vpop.f32.mrf.mxu0  ;;  %v2301_v61 = vld [vmem:[%s4292_s15] sm:$0x1] }
 0x996   :  { %v1975_v26 = vadd.f32 %v1969_v60, %v1921_v24 }
 0x997   :  { %v3098_v62 = vpop.f32.mrf.mxu1  ;;  %3195 = vmatpush3.bf16.msra.mxu1 %v3452_v59 }
 0x999   :  { %v1972_v63 = vpop.f32.mrf.mxu1 }
 0x99b   :  { %v3099_v0 = vpop.f32.mrf.mxu1 }
 0x99d   :  { %v2023_v1 = vpop.f32.mrf.mxu1 }
 0x99e   :  { %v2029_v11 = vadd.f32 %v2023_v1, %v1975_v26 }
 0x99f   :  { %v3104_v2 = vpop.f32.mrf.mxu1 }
 0x9a1   :  { %v2026_v3 = vpop.f32.mrf.mxu1 }
 0x9a3   :  { %v3105_v4 = vpop.f32.mrf.mxu1 }
 0x9a5   :  { %v2076_v6 = vpop.f32.mrf.mxu1 }
 0x9a6   :  { %v2082_v13 = vadd.f32 %v2076_v6, %v2029_v11 }
 0x9a7   :  { %v3110_v9 = vpop.f32.mrf.mxu1 }
 0x9a9   :  { %v2079_v7 = vpop.f32.mrf.mxu1 }
 0x9ab   :  { %v3111_v29 = vpop.f32.mrf.mxu1 }
 0x9ad   :  { %v2129_v36 = vpop.f32.mrf.mxu1 }
 0x9ae   :  { %v2135_v15 = vadd.f32 %v2129_v36, %v2082_v13 }
 0x9af   :  { %v3116_v21 = vpop.f32.mrf.mxu1 }
 0x9b1   :  { %v2132_v30 = vpop.f32.mrf.mxu1 }
 0x9b3   :  { %v3117_v12 = vpop.f32.mrf.mxu1 }
 0x9b5   :  { %v2182_v14 = vpop.f32.mrf.mxu1 }
 0x9b6   :  { %v2188_v47 = vadd.f32 %v2182_v14, %v2135_v15 }
 0x9b7   :  { %v3122_v41 = vpop.f32.mrf.mxu1 }
 0x9b8   :  { %v2241_v18 = vadd.f32 %v2235_v56, %v2188_v47 }
 0x9b9   :  { %v2185_v16 = vpop.f32.mrf.mxu1 }
 0x9bb   :  { %v3123_v17 = vpop.f32.mrf.mxu1 }
 0x9bd   :  { %v2288_v27 = vpop.f32.mrf.mxu1 }
 0x9be   :  { %v2294_v34 = vadd.f32 %v2288_v27, %v2241_v18 }
 0x9bf   :  { %v3134_v19 = vpop.f32.mrf.mxu1 }
 0x9c0   :  { %v2295_v39 = vmax.f32 %v2294_v34, 0.0  ;;  %v2798_v19 = vld [vmem:[%s4292_s15] sm:$0x1] }
 0x9c1   :  { %v2291_v46 = vpop.f32.mrf.mxu1 }
 0x9c2   :  { %v2296_v23 = vpack.c.bf16 %v2295_v39, %v2295_v39 }
 0x9c3   :  { %v3135_v25 = vpop.f32.mrf.mxu1 }
 0x9c4   :  { %3141 = vmatmul.mubr.msk.bf16.vlgmr.msra.gmra.mxu0 %vm1835_vm5, %v2296_v23 }
 0x9c5   :  { %3151 = vmatpush3.bf16.msra.mxu0 %v3447_v20  ;;  %3152 = vmatprep.mubr.msk.bf16.mxu0 %vm3495_vm10, %v3494_v8 }
 0x9c6   :  { %3162 = vmatprep.subr.bf16.mxu0 %v3494_v8 }
 0x9cc   :  { %3153 = vmatmul.mubr.msk.bf16.vlgmr.msra.gmra.mxu0 %vm1877_vm11, %v2417_v31 }
 0x9cd   :  { %3163 = vmatpush3.bf16.msra.mxu0 %v3448_v28  ;;  %3164 = vmatprep.mubr.msk.bf16.mxu0 %vm3495_vm10, %v3494_v8 }
 0x9ce   :  { %3174 = vmatprep.subr.bf16.mxu0 %v3494_v8 }
 0x9d4   :  { %3165 = vmatmul.mubr.msk.bf16.vlgmr.msra.gmra.mxu0 %vm1877_vm11, %v2525_v33 }
 0x9d5   :  { %3175 = vmatpush3.bf16.msra.mxu0 %v3449_v32  ;;  %3176 = vmatprep.mubr.msk.bf16.mxu0 %vm3495_vm10, %v3494_v8 }
 0x9d6   :  { %3186 = vmatprep.subr.bf16.mxu0 %v3494_v8 }
 0x9dc   :  { %3177 = vmatmul.mubr.msk.bf16.vlgmr.msra.gmra.mxu0 %vm1877_vm11, %v2633_v37 }
 0x9dd   :  { %3187 = vmatpush3.bf16.msra.mxu0 %v3450_v35  ;;  %3188 = vmatprep.mubr.msk.bf16.mxu0 %vm3495_vm10, %v3494_v8  ;;  %v2359_v8 = vld [vmem:[%s4290_s13] sm:$0x1] }
 0x9e4   :  { %3189 = vmatmul.mubr.msk.bf16.vlgmr.msra.gmra.mxu0 %vm1877_vm11, %v2741_v38 }
 0xa00   :  { %v2407_v40 = vpop.f32.mrf.mxu1 }
 0xa01   :  { %v2413_v4 = vadd.f32 %v2407_v40, %v2359_v8 }
 0xa02   :  { %v3148_v42 = vpop.f32.mrf.mxu1 }
 0xa04   :  { %v2410_v43 = vpop.f32.mrf.mxu1 }
 0xa06   :  { %v3149_v44 = vpop.f32.mrf.mxu1 }
 0xa08   :  { %v2515_v45 = vpop.f32.mrf.mxu1 }
 0xa0a   :  { %v3160_v48 = vpop.f32.mrf.mxu1 }
 0xa0c   :  { %v2518_v49 = vpop.f32.mrf.mxu1 }
 0xa0e   :  { %v3161_v50 = vpop.f32.mrf.mxu1 }
 0xa10   :  { %v2623_v51 = vpop.f32.mrf.mxu1 }
 0xa12   :  { %v3172_v5 = vpop.f32.mrf.mxu1 }
 0xa14   :  { %v2626_v52 = vpop.f32.mrf.mxu1 }
 0xa16   :  { %v3173_v53 = vpop.f32.mrf.mxu1 }
 0xa18   :  { %v2731_v54 = vpop.f32.mrf.mxu1 }
 0xa1a   :  { %v3184_v55 = vpop.f32.mrf.mxu1 }
 0xa1c   :  { %v2734_v56 = vpop.f32.mrf.mxu1 }
 0xa1e   :  { %v3185_v57 = vpop.f32.mrf.mxu1 }
 0xa84   :  { %v2351_v60 = vpop.f32.mrf.mxu0 }
 0xa85   :  { %v2352_v22 = vadd.f32 %v2351_v60, %v2301_v61 }
 0xa86   :  { %v3142_v62 = vpop.f32.mrf.mxu0 }
 0xa87   :  { %2358 = vst.msk [vmem:[#allocation5] sm:$0x1] %vm2357_vm12, %v2352_v22 }
 0xa88   :  { %v2354_v63 = vpop.f32.mrf.mxu0 }
 0xa8a   :  { %v3143_v0 = vpop.f32.mrf.mxu0 }
 0xa8c   :  { %v2461_v1 = vpop.f32.mrf.mxu0 }
 0xa8d   :  { %v2467_v9 = vadd.f32 %v2461_v1, %v2413_v4 }
 0xa8e   :  { %v3154_v2 = vpop.f32.mrf.mxu0 }
 0xa8f   :  { %v2521_v29 = vadd.f32 %v2515_v45, %v2467_v9 }
 0xa90   :  { %v2464_v3 = vpop.f32.mrf.mxu0 }
 0xa92   :  { %v3155_v6 = vpop.f32.mrf.mxu0 }
 0xa94   :  { %v2569_v7 = vpop.f32.mrf.mxu0 }
 0xa95   :  { %v2575_v24 = vadd.f32 %v2569_v7, %v2521_v29 }
 0xa96   :  { %v3166_v10 = vpop.f32.mrf.mxu0 }
 0xa97   :  { %v2629_v30 = vadd.f32 %v2623_v51, %v2575_v24 }
 0xa98   :  { %v2572_v36 = vpop.f32.mrf.mxu0 }
 0xa9a   :  { %v3167_v21 = vpop.f32.mrf.mxu0 }
 0xa9c   :  { %v2677_v26 = vpop.f32.mrf.mxu0 }
 0xa9d   :  { %v2683_v12 = vadd.f32 %v2677_v26, %v2629_v30 }
 0xa9e   :  { %v3178_v11 = vpop.f32.mrf.mxu0 }
 0xa9f   :  { %v2737_v15 = vadd.f32 %v2731_v54, %v2683_v12 }
 0xaa0   :  { %v2680_v13 = vpop.f32.mrf.mxu0 }
 0xaa2   :  { %v3179_v14 = vpop.f32.mrf.mxu0 }
 0xaa4   :  { %v2785_v41 = vpop.f32.mrf.mxu0 }
 0xaa5   :  { %v2791_v47 = vadd.f32 %v2785_v41, %v2737_v15 }
 0xaa6   :  { %v3190_v16 = vpop.f32.mrf.mxu0 }
 0xaa7   :  { %v2792_v17 = vmax.f32 %v2791_v47, 0.0 }
 0xaa8   :  { %v2788_v18 = vpop.f32.mrf.mxu0 }
 0xaa9   :  { %v2793_v27 = vpack.c.bf16 %v2792_v17, %v2792_v17 }
 0xaaa   :  { %v3191_v34 = vpop.f32.mrf.mxu0 }
 0xaab   :  { %3197 = vmatmul.mubr.msk.bf16.vlgmr.msra.gmra.mxu1 %vm1835_vm5, %v2793_v27 }
 0xb6b   :  { %v2848_v39 = vpop.f32.mrf.mxu1 }
 0xb6c   :  { %v2849_v46 = vadd.f32 %v2848_v39, %v2798_v19 }
 0xb6d   :  { %v3198_v20 = vpop.f32.mrf.mxu1 }
 0xb6e   :  { %2854 = vst.msk [vmem:[#allocation5 + $0x1] sm:$0x1] %vm2357_vm12, %v2849_v46 }
 0xb6f   :  { %v2851_v23 = vpop.f32.mrf.mxu1 }
 0xb70   :  { %3468 = shalt.err (!%p3465_p4)
}
 0xb71   :  { %2864 = dma.vmem_to_hbm [thread:$0]  %s2862_s7, 32, %s4293_s16, [#allocation6]   ;;  %v3199_v25 = vpop.f32.mrf.mxu1 }
 0xb72   :  { %3477 = dma.done.wait [#allocation6], 32  }
 0xb73   :  { %3478 = vsyncadd [#allocation6], 4294967264 }
 0xb74   :  { %2868 = vsyncpa [#allocation6], 1 }

</bundles_post_ra>
